<compile_context>
chip_gen: v5e
topology: v5e:2x2
jax: 0.10.0
libtpu: 0.0.40
codegen_flags: <defaults>
</compile_context>

<pallas_src>
import functools

import numpy as np

import jax
import jax.numpy as jnp
from jax.experimental import pallas as pl
from jax.experimental.pallas import tpu as pltpu


def _round_up(x, m):
    return ((x + m - 1) // m) * m


def _cdiv(a, b):
    return (a + b - 1) // b


# ---------------------------------------------------------------------------
# Pallas kernel
#   grid = (B, n_row_tiles)      [batch "parallel", row tiles "arbitrary"]
#   per step: 9 tap matmuls (bf16 x bf16 -> f32) over a row tile of the padded image,
#   + bias + ReLU (+ optional prefix row mask), partial spatial sum accumulated into a
#   VMEM scratch; on the last row tile: fused head matmul, two masked softmaxes,
#   lane-dense packed store.
# ---------------------------------------------------------------------------
def idm_kernel(x_ref,            # (1, Hpad+2, W+2, Cin)  bf16  padded image of batch b
               w_conv_ref,       # (9, Cin, Chid_pad)     bf16
               b_conv_ref,       # (1, Chid_pad)          f32
               w_heads_ref,      # (Chid_pad, OUTP)       bf16  [w_cls | w_act | 0]
               b_heads_ref,      # (1, OUTP)              f32   [b_cls | b_act | 0]
               out_ref,          # (1, 2, OUTP)           f32   row0: raw, row1: softmax
               feat_ref,         # (1, Chid_pad)          f32   VMEM scratch (pooled sum)
               *, row_tile, width, height, inv_hw, nc, na, masked):
    ri = pl.program_id(1)
    n_r = pl.num_programs(1)
    cin = w_conv_ref.shape[1]

    @pl.when(ri == 0)
    def _init():
        feat_ref[...] = jnp.zeros_like(feat_ref)

    # Output rows [ri*row_tile, ri*row_tile + row_tile); padded-row start for tap dy is +dy.
    rs = pl.multiple_of(ri * row_tile, row_tile)

    # 3x3 conv as 9 accumulating tap-matmuls (fused im2col).  K = Cin, accumulate in f32.
    conv = None
    tap = 0
    for dy in range(3):
        for dx in range(3):
            slab = x_ref[0, pl.ds(rs + dy, row_tile), pl.ds(dx, width), :]   # (tr, W, Cin) bf16
            part = jnp.dot(slab.reshape(row_tile * width, cin),
                           w_conv_ref[tap],
                           preferred_element_type=jnp.float32)               # (tr*W, Chid)
            conv = part if conv is None else conv + part
            tap += 1

    conv = jnp.maximum(conv + b_conv_ref[...], 0.0)                          # bias + ReLU

    if masked:
        # Last row tile may be partial (H not divisible by row_tile).  Valid rows are a
        # prefix of the tile, so one cheap iota-compare masks the padded rows (whose
        # ReLU(bias) would otherwise pollute the pooled mean).  Statically skipped when
        # H divides evenly — zero cost on the common path.
        valid_rows = jnp.minimum(row_tile, height - ri * row_tile)
        rowmask = (jax.lax.broadcasted_iota(jnp.int32, (row_tile * width, 1), 0)
                   < valid_rows * width)
        conv = jnp.where(rowmask, conv, 0.0)

    # Partial global-average-pool: accumulate the spatial sum for this row tile.
    feat_ref[...] += jnp.sum(conv, axis=0, keepdims=True)                    # (1, Chid)

    @pl.when(ri == n_r - 1)
    def _finalize():
        # mean pool (1/HW folded here: one vreg multiply), bf16 operands for the MXU.
        feat = (feat_ref[...] * inv_hw).astype(jnp.bfloat16)                 # (1, Chid)
        raw = jnp.dot(feat, w_heads_ref[...],
                      preferred_element_type=jnp.float32) + b_heads_ref[...]  # (1, OUTP)

        lane = jax.lax.broadcasted_iota(jnp.int32, raw.shape, 1)

        def masked_softmax(z, lo, hi):
            m = (lane >= lo) & (lane < hi)
            zm = jnp.where(m, z, -1e30)
            mx = jnp.max(zm, axis=1, keepdims=True)
            e = jnp.where(m, jnp.exp(z - mx), 0.0)
            s = jnp.sum(e, axis=1, keepdims=True)
            return e * pl.reciprocal(s, approx=True)

        # softmax(dim=1) over classes (lanes [0, nc)) and actions (lanes [nc, nc+na)).
        probs = masked_softmax(raw, 0, nc) + masked_softmax(raw, nc, nc + na)

        out_ref[0] = jnp.concatenate([raw, probs], axis=0)                   # (2, OUTP)


def run_idm_kernel(x_pad, w_conv, b_conv, w_heads, b_heads,
                   *, height, width, row_tile, num_classes, num_actions):
    b, hp, wp, cin = x_pad.shape
    assert wp == width + 2
    n_row_tiles = (hp - 2) // row_tile
    assert n_row_tiles * row_tile == hp - 2, "padded height must be a row_tile multiple"
    masked = (n_row_tiles * row_tile != height)
    chid_pad = w_conv.shape[-1]
    outp = w_heads.shape[-1]

    kernel = functools.partial(
        idm_kernel, row_tile=row_tile, width=width, height=height,
        inv_hw=1.0 / float(height * width),
        nc=num_classes, na=num_actions, masked=masked)

    out_shape = jax.ShapeDtypeStruct((b, 2, outp), jnp.float32)

    return pl.pallas_call(
        kernel,
        out_shape=out_shape,
        grid_spec=pltpu.PrefetchScalarGridSpec(
            num_scalar_prefetch=0,
            grid=(b, n_row_tiles),
            in_specs=[
                # Whole padded image of batch b stays resident across the row-tile axis
                # (same block index across ri -> fetched once per batch element).
                pl.BlockSpec((1, hp, wp, cin), lambda bi, ri: (bi, 0, 0, 0)),
                pl.BlockSpec(w_conv.shape, lambda bi, ri: (0, 0, 0)),
                pl.BlockSpec(b_conv.shape, lambda bi, ri: (0, 0)),
                pl.BlockSpec(w_heads.shape, lambda bi, ri: (0, 0)),
                pl.BlockSpec(b_heads.shape, lambda bi, ri: (0, 0)),
            ],
            # Single lane-dense packed output block per batch element.
            out_specs=pl.BlockSpec((1, 2, outp), lambda bi, ri: (bi, 0, 0)),
            scratch_shapes=[pltpu.VMEM((1, chid_pad), jnp.float32)],
        ),
        compiler_params=pltpu.CompilerParams(
            dimension_semantics=("parallel", "arbitrary")),
    )(x_pad, w_conv, b_conv, w_heads, b_heads)


# ---------------------------------------------------------------------------
# IDM module (Pallas-backed).
# ---------------------------------------------------------------------------
class IDMPallas:
    def __init__(self, num_classes, num_actions, in_channels=3, hidden=32,
                 row_tile=None, seed=0):
        self.num_classes = num_classes
        self.num_actions = num_actions
        self.in_channels = in_channels
        self.hidden = hidden
        self.row_tile = row_tile
        self.nms_threshold = 0.4

        key = jax.random.PRNGKey(seed)
        k1, k2, k3, k4, k5, k6 = jax.random.split(key, 6)
        kin = 9 * in_channels
        scale = 0.1
        # Logical (reference) parameters, f32, same layout as the original implementation.
        self.w_conv = (scale * jax.random.normal(k1, (kin, hidden))).astype(jnp.float32)
        self.b_conv = (scale * jax.random.normal(k2, (1, hidden))).astype(jnp.float32)
        self.w_cls = (scale * jax.random.normal(k3, (hidden, num_classes))).astype(jnp.float32)
        self.b_cls = (scale * jax.random.normal(k4, (1, num_classes))).astype(jnp.float32)
        self.w_act = (scale * jax.random.normal(k5, (hidden, num_actions))).astype(jnp.float32)
        self.b_act = (scale * jax.random.normal(k6, (1, num_actions))).astype(jnp.float32)

        # Kernel-packed parameters (built once): hidden padded to 128 lanes, heads fused
        # into one (Chid_pad, 128) matrix, matmul operands cast to bf16.  Zero padding
        # keeps the math exactly equal to the unpadded model.
        chid_pad = _round_up(hidden, 128)
        outp = _round_up(num_classes + num_actions, 128)
        self.chid_pad = chid_pad
        self.outp = outp

        wc = jnp.zeros((9, in_channels, chid_pad), jnp.float32)
        wc = wc.at[:, :, :hidden].set(self.w_conv.reshape(9, in_channels, hidden))
        self.w_conv_k = wc.astype(jnp.bfloat16)
        self.b_conv_k = jnp.zeros((1, chid_pad), jnp.float32).at[:, :hidden].set(self.b_conv)

        wh = jnp.zeros((chid_pad, outp), jnp.float32)
        wh = wh.at[:hidden, :num_classes].set(self.w_cls)
        wh = wh.at[:hidden, num_classes:num_classes + num_actions].set(self.w_act)
        self.w_heads_k = wh.astype(jnp.bfloat16)

        bh = jnp.zeros((1, outp), jnp.float32)
        bh = bh.at[:, :num_classes].set(self.b_cls)
        bh = bh.at[:, num_classes:num_classes + num_actions].set(self.b_act)
        self.b_heads_k = bh

        # Jitted entry points: one dispatch, one device->host sync for predict().
        self._forward_jit = jax.jit(self._model)
        self._predict_jit = jax.jit(self._predict_core)

    # ---- helpers ----------------------------------------------------------
    def _pick_row_tile(self, h, w):
        if self.row_tile is not None:
            return max(1, min(self.row_tile, h))
        # Aim for ~1024 conv rows per grid step (f32 conv tile ~0.5 MB with Chid_pad=128,
        # comfortably inside scoped VMEM on v5e/v6e/v7x alongside the resident image
        # block); partial last tiles are handled by the in-kernel prefix mask.
        return max(1, min(h, 1024 // max(w, 1)))

    def _model(self, images_nchw):
        images_nchw = images_nchw.astype(jnp.float32)
        b, c, h, w = images_nchw.shape
        rt = self._pick_row_tile(h, w)
        n_tiles = _cdiv(h, rt)
        hpad = n_tiles * rt
        # Single fused XLA pass: NCHW -> NHWC, zero-pad H/W by 1 (plus bottom fill rows so
        # every row tile is full), cast to bf16 (halves the DMA bytes of the dominant
        # image stream).  No 9x im2col slab is materialized.
        x_pad = jnp.pad(jnp.transpose(images_nchw, (0, 2, 3, 1)),
                        ((0, 0), (1, 1 + hpad - h), (1, 1), (0, 0))).astype(jnp.bfloat16)
        packed = run_idm_kernel(
            x_pad, self.w_conv_k, self.b_conv_k, self.w_heads_k, self.b_heads_k,
            height=h, width=w, row_tile=rt,
            num_classes=self.num_classes, num_actions=self.num_actions)

        nc, na = self.num_classes, self.num_actions
        raw = packed[:, 0, :]
        probs = packed[:, 1, :]
        logits = raw[:, :nc]
        actions = raw[:, nc:nc + na]
        outputs = {
            "pred_logits": logits[:, None, :],      # (B, 1, num_classes)
            "pred_actions": actions[:, None, :],    # (B, 1, num_actions)
            "_softmax_logits": probs[:, :nc],       # softmax(dim=1) over classes
            "_softmax_actions": probs[:, nc:nc + na],
        }
        return outputs

    # ---- public API -------------------------------------------------------
    def forward(self, images, targets=None, do_loss=False):
        outputs = self._forward_jit(images)
        # TODO(synk): do_loss=True path needs DETR SetCriterion (Hungarian matching);
        # only the do_loss=False branch is reproduced.
        return {
            "outputs": outputs,
            "losses": None,
            "loss_dict_reduced": None,
            "loss_value": None,
            "loss_dict_reduced_unscaled": None,
            "loss_dict_reduced_scaled": None,
            "postprocessors": None,
        }

    def _predict_core(self, images):
        outputs = self._model(images)
        probs_act = outputs["_softmax_actions"]
        probs_cls = outputs["_softmax_logits"]
        logits = outputs["pred_logits"][:, 0, :]
        # torch.argmax with no dim -> argmax over the flattened tensor (meaningful for B=1).
        pred_action = jnp.argmax(probs_act.reshape(-1))
        pred_label = jnp.argmax(probs_cls.reshape(-1))
        # forceobject: softmax over the first nc-1 classes, then flattened argmax.
        probs_force = jax.nn.softmax(logits[:, :-1], axis=1)
        pred_label_force = jnp.argmax(probs_force.reshape(-1))
        return jnp.stack([pred_action, pred_label, pred_label_force]).astype(jnp.int32)

    def predict(self, images):
        res = jax.device_get(self._predict_jit(images))   # single host sync
        return {
            "pred_action": int(res[0]),
            "pred_label": int(res[1]),
            "pred_label_forceobject": int(res[2]),
        }


# ---------------------------------------------------------------------------
# Pure-JAX f32 reference (same math, no Pallas) for a correctness check.
# ---------------------------------------------------------------------------
def _reference_outputs(idm, images_nchw):
    x = jnp.transpose(images_nchw.astype(jnp.float32), (0, 2, 3, 1))
    b, h, w, c = x.shape
    xp = jnp.pad(x, ((0, 0), (1, 1), (1, 1), (0, 0)))
    cols = [xp[:, dy:dy + h, dx:dx + w, :] for dy in range(3) for dx in range(3)]
    p = jnp.stack(cols, axis=3).reshape(b, h * w, 9 * c)
    conv = jnp.maximum(jnp.einsum("bpk,kd->bpd", p, idm.w_conv) + idm.b_conv, 0.0)
    feat = conv.mean(axis=1)
    logits = feat @ idm.w_cls + idm.b_cls
    acts = feat @ idm.w_act + idm.b_act
    return (logits, acts,
            jax.nn.softmax(logits, axis=1), jax.nn.softmax(acts, axis=1))


def _check(idm, images, atol=2e-2, rtol=2e-2):
    out = idm.forward(images, do_loss=False)
    logits = out["outputs"]["pred_logits"][:, 0, :]
    actions = out["outputs"]["pred_actions"][:, 0, :]
    probs_cls = out["outputs"]["_softmax_logits"]
    probs_act = out["outputs"]["_softmax_actions"]
    jax.block_until_ready(logits)
    jax.block_until_ready(actions)
    r_logits, r_actions, r_pcls, r_pact = _reference_outputs(idm, images)
    np.testing.assert_allclose(np.asarray(logits), np.asarray(r_logits), atol=atol, rtol=rtol)
    np.testing.assert_allclose(np.asarray(actions), np.asarray(r_actions), atol=atol, rtol=rtol)
    np.testing.assert_allclose(np.asarray(probs_cls), np.asarray(r_pcls), atol=atol, rtol=rtol)
    np.testing.assert_allclose(np.asarray(probs_act), np.asarray(r_pact), atol=atol, rtol=rtol)


if __name__ == "__main__":
    key = jax.random.PRNGKey(0)
    k1, k2 = jax.random.split(key)

    # Small shapes: batch=2, RGB images 16x16 (NCHW, PyTorch convention).
    images = jax.random.normal(k1, (2, 3, 16, 16), dtype=jnp.float32)

    # row_tile=8 -> 2 full row tiles per image, exercising the pooled-sum accumulation path.
    idm = IDMPallas(num_classes=8, num_actions=4, in_channels=3, hidden=32, row_tile=8)
    _check(idm, images)

    # Non-divisible height (H=12 with row_tile=8 -> one full + one partial tile),
    # exercising the statically-gated prefix row mask.
    images_odd = jax.random.normal(k2, (1, 3, 12, 16), dtype=jnp.float32)
    idm_odd = IDMPallas(num_classes=8, num_actions=4, in_channels=3, hidden=32, row_tile=8)
    _check(idm_odd, images_odd)

    # predict() semantics (argmax over flattened softmax) — single image, single host sync.
    preds = idm.predict(images[:1])
    assert 0 <= preds["pred_action"] < 4
    assert 0 <= preds["pred_label"] < 8
    assert 0 <= preds["pred_label_forceobject"] < 7

    print("KERNEL_OK")
</pallas_src>

<mosaic_0001>
module attributes {stable_mosaic.version = 11 : i64} {
  func.func @idm_kernel(%arg0: i32, %arg1: i32, %arg2: memref<1x18x18x3xbf16, #tpu.memory_space<vmem>>, %arg3: memref<9x3x128xbf16, #tpu.memory_space<vmem>>, %arg4: memref<1x128xf32, #tpu.memory_space<vmem>>, %arg5: memref<128x128xbf16, #tpu.memory_space<vmem>>, %arg6: memref<1x128xf32, #tpu.memory_space<vmem>>, %arg7: memref<1x2x128xf32, #tpu.memory_space<vmem>>, %arg8: memref<1x128xf32, #tpu.memory_space<vmem>>) attributes {dimension_semantics = [#tpu.dimension_semantics<parallel>, #tpu.dimension_semantics<arbitrary>], iteration_bounds = array<i64: 2, 2>, scalar_prefetch = 0 : i64, scratch_operands = 1 : i64, tpu.core_type = #tpu.core_type<tc>, window_params = [{transform_indices = @transform_0, window_bounds = array<i64: 1, 18, 18, 3>}, {pipeline_mode = #tpu.pipeline_mode<synchronous>, transform_indices = @transform_1, window_bounds = array<i64: 9, 3, 128>}, {pipeline_mode = #tpu.pipeline_mode<synchronous>, transform_indices = @transform_2, window_bounds = array<i64: 1, 128>}, {pipeline_mode = #tpu.pipeline_mode<synchronous>, transform_indices = @transform_3, window_bounds = array<i64: 128, 128>}, {pipeline_mode = #tpu.pipeline_mode<synchronous>, transform_indices = @transform_4, window_bounds = array<i64: 1, 128>}, {transform_indices = @transform_5, window_bounds = array<i64: 1, 2, 128>}]} {
    %c0_i32 = arith.constant 0 : i32
    %0 = arith.cmpi eq, %arg1, %c0_i32 : i32
    %1 = arith.extui %0 : i1 to i32
    %c0_i32_0 = arith.constant 0 : i32
    %2 = arith.cmpi ne, %1, %c0_i32_0 : i32
    scf.if %2 {
      %cst_71 = arith.constant 0.000000e+00 : f32
      %98 = vector.broadcast %cst_71 : f32 to vector<1x128xf32>
      %c0_72 = arith.constant 0 : index
      %c0_73 = arith.constant 0 : index
      %99 = vector.load %arg8[%c0_72, %c0_73] : memref<1x128xf32, #tpu.memory_space<vmem>>, vector<1x128xf32>
      tpu.vector_store %arg8[%c0_72, %c0_73], %98 {strides = array<i32>} : memref<1x128xf32, #tpu.memory_space<vmem>>, vector<1x128xf32>,
    } else {
    }
    %c8_i32 = arith.constant 8 : i32
    %3 = arith.muli %arg1, %c8_i32 : i32
    %4 = tpu.assume_multiple %3, 8 : i32
    %c0_i32_1 = arith.constant 0 : i32
    %5 = arith.addi %4, %c0_i32_1 : i32
    %c0 = arith.constant 0 : index
    %6 = arith.index_cast %5 : i32 to index
    %c0_2 = arith.constant 0 : index
    %c0_3 = arith.constant 0 : index
    %7 = vector.load %arg2[%c0, %6, %c0_2, %c0_3] : memref<1x18x18x3xbf16, #tpu.memory_space<vmem>>, vector<1x8x16x3xbf16>
    %8 = vector.shape_cast %7 : vector<1x8x16x3xbf16> to vector<8x16x3xbf16>
    %9 = vector.shape_cast %8 : vector<8x16x3xbf16> to vector<128x3xbf16>
    %c0_4 = arith.constant 0 : index
    %c0_5 = arith.constant 0 : index
    %c0_6 = arith.constant 0 : index
    %10 = vector.load %arg3[%c0_4, %c0_5, %c0_6] : memref<9x3x128xbf16, #tpu.memory_space<vmem>>, vector<1x3x128xbf16>
    %11 = vector.shape_cast %10 : vector<1x3x128xbf16> to vector<3x128xbf16>
    %cst = arith.constant dense<0.000000e+00> : vector<128x128xf32>
    %12 = tpu.matmul %9, %11, %cst {dimension_numbers = #tpu.dot_dimension_numbers<[1], [0], [0], [1], [0, 0, 1, 1], [], []>} : vector<128x3xbf16>, vector<3x128xbf16>, vector<128x128xf32> -> vector<128x128xf32>
    %c0_i32_7 = arith.constant 0 : i32
    %13 = arith.addi %4, %c0_i32_7 : i32
    %c0_8 = arith.constant 0 : index
    %14 = arith.index_cast %13 : i32 to index
    %c1 = arith.constant 1 : index
    %c0_9 = arith.constant 0 : index
    %15 = vector.load %arg2[%c0_8, %14, %c1, %c0_9] : memref<1x18x18x3xbf16, #tpu.memory_space<vmem>>, vector<1x8x16x3xbf16>
    %16 = vector.shape_cast %15 : vector<1x8x16x3xbf16> to vector<8x16x3xbf16>
    %17 = vector.shape_cast %16 : vector<8x16x3xbf16> to vector<128x3xbf16>
    %c1_10 = arith.constant 1 : index
    %c0_11 = arith.constant 0 : index
    %c0_12 = arith.constant 0 : index
    %18 = vector.load %arg3[%c1_10, %c0_11, %c0_12] : memref<9x3x128xbf16, #tpu.memory_space<vmem>>, vector<1x3x128xbf16>
    %19 = vector.shape_cast %18 : vector<1x3x128xbf16> to vector<3x128xbf16>
    %cst_13 = arith.constant dense<0.000000e+00> : vector<128x128xf32>
    %20 = tpu.matmul %17, %19, %cst_13 {dimension_numbers = #tpu.dot_dimension_numbers<[1], [0], [0], [1], [0, 0, 1, 1], [], []>} : vector<128x3xbf16>, vector<3x128xbf16>, vector<128x128xf32> -> vector<128x128xf32>
    %21 = arith.addf %12, %20 : vector<128x128xf32>
    %c0_i32_14 = arith.constant 0 : i32
    %22 = arith.addi %4, %c0_i32_14 : i32
    %c0_15 = arith.constant 0 : index
    %23 = arith.index_cast %22 : i32 to index
    %c2 = arith.constant 2 : index
    %c0_16 = arith.constant 0 : index
    %24 = vector.load %arg2[%c0_15, %23, %c2, %c0_16] : memref<1x18x18x3xbf16, #tpu.memory_space<vmem>>, vector<1x8x16x3xbf16>
    %25 = vector.shape_cast %24 : vector<1x8x16x3xbf16> to vector<8x16x3xbf16>
    %26 = vector.shape_cast %25 : vector<8x16x3xbf16> to vector<128x3xbf16>
    %c2_17 = arith.constant 2 : index
    %c0_18 = arith.constant 0 : index
    %c0_19 = arith.constant 0 : index
    %27 = vector.load %arg3[%c2_17, %c0_18, %c0_19] : memref<9x3x128xbf16, #tpu.memory_space<vmem>>, vector<1x3x128xbf16>
    %28 = vector.shape_cast %27 : vector<1x3x128xbf16> to vector<3x128xbf16>
    %cst_20 = arith.constant dense<0.000000e+00> : vector<128x128xf32>
    %29 = tpu.matmul %26, %28, %cst_20 {dimension_numbers = #tpu.dot_dimension_numbers<[1], [0], [0], [1], [0, 0, 1, 1], [], []>} : vector<128x3xbf16>, vector<3x128xbf16>, vector<128x128xf32> -> vector<128x128xf32>
    %30 = arith.addf %21, %29 : vector<128x128xf32>
    %c1_i32 = arith.constant 1 : i32
    %31 = arith.addi %4, %c1_i32 : i32
    %c0_21 = arith.constant 0 : index
    %32 = arith.index_cast %31 : i32 to index
    %c0_22 = arith.constant 0 : index
    %c0_23 = arith.constant 0 : index
    %33 = vector.load %arg2[%c0_21, %32, %c0_22, %c0_23] : memref<1x18x18x3xbf16, #tpu.memory_space<vmem>>, vector<1x8x16x3xbf16>
    %34 = vector.shape_cast %33 : vector<1x8x16x3xbf16> to vector<8x16x3xbf16>
    %35 = vector.shape_cast %34 : vector<8x16x3xbf16> to vector<128x3xbf16>
    %c3 = arith.constant 3 : index
    %c0_24 = arith.constant 0 : index
    %c0_25 = arith.constant 0 : index
    %36 = vector.load %arg3[%c3, %c0_24, %c0_25] : memref<9x3x128xbf16, #tpu.memory_space<vmem>>, vector<1x3x128xbf16>
    %37 = vector.shape_cast %36 : vector<1x3x128xbf16> to vector<3x128xbf16>
    %cst_26 = arith.constant dense<0.000000e+00> : vector<128x128xf32>
    %38 = tpu.matmul %35, %37, %cst_26 {dimension_numbers = #tpu.dot_dimension_numbers<[1], [0], [0], [1], [0, 0, 1, 1], [], []>} : vector<128x3xbf16>, vector<3x128xbf16>, vector<128x128xf32> -> vector<128x128xf32>
    %39 = arith.addf %30, %38 : vector<128x128xf32>
    %c1_i32_27 = arith.constant 1 : i32
    %40 = arith.addi %4, %c1_i32_27 : i32
    %c0_28 = arith.constant 0 : index
    %41 = arith.index_cast %40 : i32 to index
    %c1_29 = arith.constant 1 : index
    %c0_30 = arith.constant 0 : index
    %42 = vector.load %arg2[%c0_28, %41, %c1_29, %c0_30] : memref<1x18x18x3xbf16, #tpu.memory_space<vmem>>, vector<1x8x16x3xbf16>
    %43 = vector.shape_cast %42 : vector<1x8x16x3xbf16> to vector<8x16x3xbf16>
    %44 = vector.shape_cast %43 : vector<8x16x3xbf16> to vector<128x3xbf16>
    %c4 = arith.constant 4 : index
    %c0_31 = arith.constant 0 : index
    %c0_32 = arith.constant 0 : index
    %45 = vector.load %arg3[%c4, %c0_31, %c0_32] : memref<9x3x128xbf16, #tpu.memory_space<vmem>>, vector<1x3x128xbf16>
    %46 = vector.shape_cast %45 : vector<1x3x128xbf16> to vector<3x128xbf16>
    %cst_33 = arith.constant dense<0.000000e+00> : vector<128x128xf32>
    %47 = tpu.matmul %44, %46, %cst_33 {dimension_numbers = #tpu.dot_dimension_numbers<[1], [0], [0], [1], [0, 0, 1, 1], [], []>} : vector<128x3xbf16>, vector<3x128xbf16>, vector<128x128xf32> -> vector<128x128xf32>
    %48 = arith.addf %39, %47 : vector<128x128xf32>
    %c1_i32_34 = arith.constant 1 : i32
    %49 = arith.addi %4, %c1_i32_34 : i32
    %c0_35 = arith.constant 0 : index
    %50 = arith.index_cast %49 : i32 to index
    %c2_36 = arith.constant 2 : index
    %c0_37 = arith.constant 0 : index
    %51 = vector.load %arg2[%c0_35, %50, %c2_36, %c0_37] : memref<1x18x18x3xbf16, #tpu.memory_space<vmem>>, vector<1x8x16x3xbf16>
    %52 = vector.shape_cast %51 : vector<1x8x16x3xbf16> to vector<8x16x3xbf16>
    %53 = vector.shape_cast %52 : vector<8x16x3xbf16> to vector<128x3xbf16>
    %c5 = arith.constant 5 : index
    %c0_38 = arith.constant 0 : index
    %c0_39 = arith.constant 0 : index
    %54 = vector.load %arg3[%c5, %c0_38, %c0_39] : memref<9x3x128xbf16, #tpu.memory_space<vmem>>, vector<1x3x128xbf16>
    %55 = vector.shape_cast %54 : vector<1x3x128xbf16> to vector<3x128xbf16>
    %cst_40 = arith.constant dense<0.000000e+00> : vector<128x128xf32>
    %56 = tpu.matmul %53, %55, %cst_40 {dimension_numbers = #tpu.dot_dimension_numbers<[1], [0], [0], [1], [0, 0, 1, 1], [], []>} : vector<128x3xbf16>, vector<3x128xbf16>, vector<128x128xf32> -> vector<128x128xf32>
    %57 = arith.addf %48, %56 : vector<128x128xf32>
    %c2_i32 = arith.constant 2 : i32
    %58 = arith.addi %4, %c2_i32 : i32
    %c0_41 = arith.constant 0 : index
    %59 = arith.index_cast %58 : i32 to index
    %c0_42 = arith.constant 0 : index
    %c0_43 = arith.constant 0 : index
    %60 = vector.load %arg2[%c0_41, %59, %c0_42, %c0_43] : memref<1x18x18x3xbf16, #tpu.memory_space<vmem>>, vector<1x8x16x3xbf16>
    %61 = vector.shape_cast %60 : vector<1x8x16x3xbf16> to vector<8x16x3xbf16>
    %62 = vector.shape_cast %61 : vector<8x16x3xbf16> to vector<128x3xbf16>
    %c6 = arith.constant 6 : index
    %c0_44 = arith.constant 0 : index
    %c0_45 = arith.constant 0 : index
    %63 = vector.load %arg3[%c6, %c0_44, %c0_45] : memref<9x3x128xbf16, #tpu.memory_space<vmem>>, vector<1x3x128xbf16>
    %64 = vector.shape_cast %63 : vector<1x3x128xbf16> to vector<3x128xbf16>
    %cst_46 = arith.constant dense<0.000000e+00> : vector<128x128xf32>
    %65 = tpu.matmul %62, %64, %cst_46 {dimension_numbers = #tpu.dot_dimension_numbers<[1], [0], [0], [1], [0, 0, 1, 1], [], []>} : vector<128x3xbf16>, vector<3x128xbf16>, vector<128x128xf32> -> vector<128x128xf32>
    %66 = arith.addf %57, %65 : vector<128x128xf32>
    %c2_i32_47 = arith.constant 2 : i32
    %67 = arith.addi %4, %c2_i32_47 : i32
    %c0_48 = arith.constant 0 : index
    %68 = arith.index_cast %67 : i32 to index
    %c1_49 = arith.constant 1 : index
    %c0_50 = arith.constant 0 : index
    %69 = vector.load %arg2[%c0_48, %68, %c1_49, %c0_50] : memref<1x18x18x3xbf16, #tpu.memory_space<vmem>>, vector<1x8x16x3xbf16>
    %70 = vector.shape_cast %69 : vector<1x8x16x3xbf16> to vector<8x16x3xbf16>
    %71 = vector.shape_cast %70 : vector<8x16x3xbf16> to vector<128x3xbf16>
    %c7 = arith.constant 7 : index
    %c0_51 = arith.constant 0 : index
    %c0_52 = arith.constant 0 : index
    %72 = vector.load %arg3[%c7, %c0_51, %c0_52] : memref<9x3x128xbf16, #tpu.memory_space<vmem>>, vector<1x3x128xbf16>
    %73 = vector.shape_cast %72 : vector<1x3x128xbf16> to vector<3x128xbf16>
    %cst_53 = arith.constant dense<0.000000e+00> : vector<128x128xf32>
    %74 = tpu.matmul %71, %73, %cst_53 {dimension_numbers = #tpu.dot_dimension_numbers<[1], [0], [0], [1], [0, 0, 1, 1], [], []>} : vector<128x3xbf16>, vector<3x128xbf16>, vector<128x128xf32> -> vector<128x128xf32>
    %75 = arith.addf %66, %74 : vector<128x128xf32>
    %c2_i32_54 = arith.constant 2 : i32
    %76 = arith.addi %4, %c2_i32_54 : i32
    %c0_55 = arith.constant 0 : index
    %77 = arith.index_cast %76 : i32 to index
    %c2_56 = arith.constant 2 : index
    %c0_57 = arith.constant 0 : index
    %78 = vector.load %arg2[%c0_55, %77, %c2_56, %c0_57] : memref<1x18x18x3xbf16, #tpu.memory_space<vmem>>, vector<1x8x16x3xbf16>
    %79 = vector.shape_cast %78 : vector<1x8x16x3xbf16> to vector<8x16x3xbf16>
    %80 = vector.shape_cast %79 : vector<8x16x3xbf16> to vector<128x3xbf16>
    %c8 = arith.constant 8 : index
    %c0_58 = arith.constant 0 : index
    %c0_59 = arith.constant 0 : index
    %81 = vector.load %arg3[%c8, %c0_58, %c0_59] : memref<9x3x128xbf16, #tpu.memory_space<vmem>>, vector<1x3x128xbf16>
    %82 = vector.shape_cast %81 : vector<1x3x128xbf16> to vector<3x128xbf16>
    %cst_60 = arith.constant dense<0.000000e+00> : vector<128x128xf32>
    %83 = tpu.matmul %80, %82, %cst_60 {dimension_numbers = #tpu.dot_dimension_numbers<[1], [0], [0], [1], [0, 0, 1, 1], [], []>} : vector<128x3xbf16>, vector<3x128xbf16>, vector<128x128xf32> -> vector<128x128xf32>
    %84 = arith.addf %75, %83 : vector<128x128xf32>
    %c0_61 = arith.constant 0 : index
    %c0_62 = arith.constant 0 : index
    %85 = vector.load %arg4[%c0_61, %c0_62] : memref<1x128xf32, #tpu.memory_space<vmem>>, vector<1x128xf32>
    %86 = vector.broadcast %85 : vector<1x128xf32> to vector<128x128xf32>
    %87 = arith.addf %84, %86 : vector<128x128xf32>
    %cst_63 = arith.constant 0.000000e+00 : f32
    %88 = vector.broadcast %cst_63 : f32 to vector<128x128xf32>
    %89 = arith.maximumf %87, %88 : vector<128x128xf32>
    %c0_64 = arith.constant 0 : index
    %c0_65 = arith.constant 0 : index
    %90 = vector.load %arg8[%c0_64, %c0_65] : memref<1x128xf32, #tpu.memory_space<vmem>>, vector<1x128xf32>
    %cst_66 = arith.constant dense<0.000000e+00> : vector<128xf32>
    %91 = vector.multi_reduction <add>, %89, %cst_66 [0] : vector<128x128xf32> to vector<128xf32>
    %92 = vector.shape_cast %91 : vector<128xf32> to vector<1x128xf32>
    %93 = arith.addf %90, %92 : vector<1x128xf32>
    %c0_67 = arith.constant 0 : index
    %c0_68 = arith.constant 0 : index
    %94 = vector.load %arg8[%c0_67, %c0_68] : memref<1x128xf32, #tpu.memory_space<vmem>>, vector<1x128xf32>
    tpu.vector_store %arg8[%c0_67, %c0_68], %93 {strides = array<i32>} : memref<1x128xf32, #tpu.memory_space<vmem>>, vector<1x128xf32>,
    %c1_i32_69 = arith.constant 1 : i32
    %95 = arith.cmpi eq, %arg1, %c1_i32_69 : i32
    %96 = arith.extui %95 : i1 to i32
    %c0_i32_70 = arith.constant 0 : i32
    %97 = arith.cmpi ne, %96, %c0_i32_70 : i32
    scf.if %97 {
      %c0_71 = arith.constant 0 : index
      %c0_72 = arith.constant 0 : index
      %98 = vector.load %arg8[%c0_71, %c0_72] : memref<1x128xf32, #tpu.memory_space<vmem>>, vector<1x128xf32>
      %cst_73 = arith.constant 3.906250e-03 : f32
      %99 = vector.broadcast %cst_73 : f32 to vector<1x128xf32>
      %100 = arith.mulf %98, %99 : vector<1x128xf32>
      %101 = arith.truncf %100 : vector<1x128xf32> to vector<1x128xbf16>
      %c0_74 = arith.constant 0 : index
      %c0_75 = arith.constant 0 : index
      %102 = vector.load %arg5[%c0_74, %c0_75] : memref<128x128xbf16, #tpu.memory_space<vmem>>, vector<128x128xbf16>
      %cst_76 = arith.constant dense<0.000000e+00> : vector<1x128xf32>
      %103 = tpu.matmul %101, %102, %cst_76 {dimension_numbers = #tpu.dot_dimension_numbers<[1], [0], [0], [1], [0, 0, 1, 1], [], []>} : vector<1x128xbf16>, vector<128x128xbf16>, vector<1x128xf32> -> vector<1x128xf32>
      %c0_77 = arith.constant 0 : index
      %c0_78 = arith.constant 0 : index
      %104 = vector.load %arg6[%c0_77, %c0_78] : memref<1x128xf32, #tpu.memory_space<vmem>>, vector<1x128xf32>
      %105 = arith.addf %103, %104 : vector<1x128xf32>
      %106 = tpu.iota {dimensions = array<i32: 1>} : vector<1x128xi32>
      %c0_i32_79 = arith.constant 0 : i32
      %107 = vector.broadcast %c0_i32_79 : i32 to vector<1x128xi32>
      %108 = arith.cmpi sge, %106, %107 : vector<1x128xi32>
      %c8_i32_80 = arith.constant 8 : i32
      %109 = vector.broadcast %c8_i32_80 : i32 to vector<1x128xi32>
      %110 = arith.cmpi slt, %106, %109 : vector<1x128xi32>
      %111 = arith.andi %108, %110 : vector<1x128xi1>
      %cst_81 = arith.constant -1.000000e+30 : f32
      %112 = vector.broadcast %cst_81 : f32 to vector<1x128xf32>
      %113 = arith.select %111, %105, %112 : vector<1x128xi1>, vector<1x128xf32>
      %cst_82 = arith.constant dense<0xFF800000> : vector<1xf32>
      %114 = vector.multi_reduction <maximumf>, %113, %cst_82 [1] : vector<1x128xf32> to vector<1xf32>
      %115 = vector.shape_cast %114 : vector<1xf32> to vector<1x1xf32>
      %116 = vector.broadcast %115 : vector<1x1xf32> to vector<1x128xf32>
      %117 = arith.subf %105, %116 : vector<1x128xf32>
      %118 = math.exp %117 : vector<1x128xf32>
      %cst_83 = arith.constant 0.000000e+00 : f32
      %119 = vector.broadcast %cst_83 : f32 to vector<1x128xf32>
      %120 = arith.select %111, %118, %119 : vector<1x128xi1>, vector<1x128xf32>
      %cst_84 = arith.constant dense<0.000000e+00> : vector<1xf32>
      %121 = vector.multi_reduction <add>, %120, %cst_84 [1] : vector<1x128xf32> to vector<1xf32>
      %122 = vector.shape_cast %121 : vector<1xf32> to vector<1x1xf32>
      %123 = tpu.reciprocal %122 {approx = true} : vector<1x1xf32> -> vector<1x1xf32>
      %124 = vector.broadcast %123 : vector<1x1xf32> to vector<1x128xf32>
      %125 = arith.mulf %120, %124 : vector<1x128xf32>
      %c8_i32_85 = arith.constant 8 : i32
      %126 = vector.broadcast %c8_i32_85 : i32 to vector<1x128xi32>
      %127 = arith.cmpi sge, %106, %126 : vector<1x128xi32>
      %c12_i32 = arith.constant 12 : i32
      %128 = vector.broadcast %c12_i32 : i32 to vector<1x128xi32>
      %129 = arith.cmpi slt, %106, %128 : vector<1x128xi32>
      %130 = arith.andi %127, %129 : vector<1x128xi1>
      %cst_86 = arith.constant -1.000000e+30 : f32
      %131 = vector.broadcast %cst_86 : f32 to vector<1x128xf32>
      %132 = arith.select %130, %105, %131 : vector<1x128xi1>, vector<1x128xf32>
      %cst_87 = arith.constant dense<0xFF800000> : vector<1xf32>
      %133 = vector.multi_reduction <maximumf>, %132, %cst_87 [1] : vector<1x128xf32> to vector<1xf32>
      %134 = vector.shape_cast %133 : vector<1xf32> to vector<1x1xf32>
      %135 = vector.broadcast %134 : vector<1x1xf32> to vector<1x128xf32>
      %136 = arith.subf %105, %135 : vector<1x128xf32>
      %137 = math.exp %136 : vector<1x128xf32>
      %cst_88 = arith.constant 0.000000e+00 : f32
      %138 = vector.broadcast %cst_88 : f32 to vector<1x128xf32>
      %139 = arith.select %130, %137, %138 : vector<1x128xi1>, vector<1x128xf32>
      %cst_89 = arith.constant dense<0.000000e+00> : vector<1xf32>
      %140 = vector.multi_reduction <add>, %139, %cst_89 [1] : vector<1x128xf32> to vector<1xf32>
      %141 = vector.shape_cast %140 : vector<1xf32> to vector<1x1xf32>
      %142 = tpu.reciprocal %141 {approx = true} : vector<1x1xf32> -> vector<1x1xf32>
      %143 = vector.broadcast %142 : vector<1x1xf32> to vector<1x128xf32>
      %144 = arith.mulf %139, %143 : vector<1x128xf32>
      %145 = arith.addf %125, %144 : vector<1x128xf32>
      %146 = tpu.concatenate %105, %145 in 0 : vector<1x128xf32>, vector<1x128xf32> -> vector<2x128xf32>
      %c0_90 = arith.constant 0 : index
      %c0_91 = arith.constant 0 : index
      %c0_92 = arith.constant 0 : index
      %147 = vector.load %arg7[%c0_90, %c0_91, %c0_92] : memref<1x2x128xf32, #tpu.memory_space<vmem>>, vector<1x2x128xf32>
      %148 = vector.shape_cast %147 : vector<1x2x128xf32> to vector<2x128xf32>
      %149 = vector.shape_cast %146 : vector<2x128xf32> to vector<1x2x128xf32>
      tpu.vector_store %arg7[%c0_90, %c0_91, %c0_92], %149 {strides = array<i32>} : memref<1x2x128xf32, #tpu.memory_space<vmem>>, vector<1x2x128xf32>,
    } else {
    }
    return
  }
  func.func @transform_0(%arg0: i32, %arg1: i32) -> (i32, i32, i32, i32) {
    %c0_i32 = arith.constant 0 : i32
    %c0_i32_0 = arith.constant 0 : i32
    %c0_i32_1 = arith.constant 0 : i32
    %c0_i32_2 = arith.constant 0 : i32
    return %arg0, %c0_i32, %c0_i32_0, %c0_i32_1 : i32, i32, i32, i32
  }
  func.func @transform_1(%arg0: i32, %arg1: i32) -> (i32, i32, i32) {
    %c0_i32 = arith.constant 0 : i32
    %c0_i32_0 = arith.constant 0 : i32
    %c0_i32_1 = arith.constant 0 : i32
    %c0_i32_2 = arith.constant 0 : i32
    return %c0_i32, %c0_i32_0, %c0_i32_1 : i32, i32, i32
  }
  func.func @transform_2(%arg0: i32, %arg1: i32) -> (i32, i32) {
    %c0_i32 = arith.constant 0 : i32
    %c0_i32_0 = arith.constant 0 : i32
    %c0_i32_1 = arith.constant 0 : i32
    return %c0_i32, %c0_i32_0 : i32, i32
  }
  func.func @transform_3(%arg0: i32, %arg1: i32) -> (i32, i32) {
    %c0_i32 = arith.constant 0 : i32
    %c0_i32_0 = arith.constant 0 : i32
    %c0_i32_1 = arith.constant 0 : i32
    return %c0_i32, %c0_i32_0 : i32, i32
  }
  func.func @transform_4(%arg0: i32, %arg1: i32) -> (i32, i32) {
    %c0_i32 = arith.constant 0 : i32
    %c0_i32_0 = arith.constant 0 : i32
    %c0_i32_1 = arith.constant 0 : i32
    return %c0_i32, %c0_i32_0 : i32, i32
  }
  func.func @transform_5(%arg0: i32, %arg1: i32) -> (i32, i32, i32) {
    %c0_i32 = arith.constant 0 : i32
    %c0_i32_0 = arith.constant 0 : i32
    %c0_i32_1 = arith.constant 0 : i32
    return %arg0, %c0_i32, %c0_i32_0 : i32, i32, i32
  }
}

</mosaic_0001>

<bundles_post_ra>
// kernel: _model.1
= control target key start
LH: loop header
LB: loop body
LE: loop exit
PB: predicated region body
PF: predicated region fallthrough
CT: control target
= control target key end

     0   :  { %s3042_s18 = smov 0   ;;  %s3044_s19 = smov 0   ;;  %s3906_s0 = inlined_call_operand.vmem [shape: bf16[2,18,18,3], index: 0, kind: input, shape index: {}]   ;;  %s3907_s1 = inlined_call_operand.vmem [shape: bf16[9,3,128], index: 1, kind: input, shape index: {}]   ;;  %s3908_s2 = inlined_call_operand.vmem [shape: f32[1,128], index: 2, kind: input, shape index: {}]   ;;  %s3909_s3 = inlined_call_operand.vmem [shape: bf16[128,128], index: 3, kind: input, shape index: {}]   ;;  %s3910_s4 = inlined_call_operand.vmem [shape: f32[1,128], index: 4, kind: input, shape index: {}]   ;;  %s3911_s5 = inlined_call_operand.vmem [shape: f32[2,2,128], index: 5, kind: output, shape index: {}]  }
   0x1   :  { %s3046_s20 = smov 0   ;;  %s3048_s21 = smov 0  }
   0x2   :  { %s3050_s22 = smov 0  }
   0x3 LB: > { %s24_s23 = sadd.s32 1, %s3000_s20  ;;  %s27_s24 = sadd.s32 1, %s3004_s21  ;;  %s3008_s22 = sphi %s3050_s22, %s15_s22   ;;  %s3004_s21 = sphi %s3048_s21, %s3921_s21   ;;  %s3000_s20 = sphi %s3046_s20, %s3920_s20   ;;  %s2996_s19 = sphi %s3044_s19, %s3919_s19   ;;  %s2992_s18 = sphi %s3042_s18, %s3918_s18  }
   0x4   : > { %p25_p0 = scmp.ge.s32.totalorder %s24_s23, 2  ;;  %p2540_p1 = scmp.ge.s32.totalorder %s3008_s22, 1 }
   0x5   : > { %p199_p2 = scmp.lt.s32.totalorder %s3008_s22, 5 }
   0x6   : > { %s3923_s23 = smov (%p25_p0, %s24_s23), 0  ;;  %s3925_s24 = smov (!%p25_p0, %s27_s24), %s3004_s21 }
   0x7   : > { %p200_p3 = pnand %p2540_p1, %p199_p2  ;;  %p29_p4 = scmp.ge.s32.totalorder %s3925_s24, 2 }
   0x8   : > { %p226_p5 = scmp.lt.s32.totalorder (!%p200_p3), %s2996_s19, 1  ;;  %p2543_p6 = scmp.ne.s32.totalorder (!%p200_p3), %s2992_s18, 0 }
   0x9   : > { %s3927_s24 = smov (%p29_p4, %s3925_s24), 0  ;;  %203 = sbr.rel (%p200_p3) target bundleno = 918 (0x396), region = 40 }
   0xe   : > { %s3929_s19 = smov (!%p226_p5, %s2996_s19), 1  ;;  %239 = sbr.rel (%p2543_p6) target bundleno = 21 (0x15), region = 44 }
   0xf   : > { %s2918_s25 = smul.u32 216, %s3929_s19  ;;  %s2542_s26 = sshll.u32 %s3929_s19, 1 }
  0x10   : > { %s3077_s29 = scalar_lea.vmem %s3911_s5, %s2542_s26 }
  0x11   : > { %s230_s7 = scalar_lea.vmem %s3906_s0, %s2918_s25 }
  0x13   : > { %v3010_v0 = vmov 0.0  }
  0x14   : > { %240 = vst [vmem:[#allocation2] sm:$0x1] %v3010_v0 }
  0x15 PF: > { %v2547_v1 = vld [vmem:[%s3907_s1 + $0x2] sm:$0x3]  ;;  %vm516_vm0 = vcmask 1040384   ;;  %vm517_vm1 = vcmask 1041408   ;;  %s2882_s10 = smul.u32 96, %s2992_s18  ;;  %v3011_v2 = vmov 65535  }
  0x16   : > { %v518_v3 = vsel %vm516_vm0, 4294967295, %v3011_v2  ;;  %vm270_vm2 = vsmask.f32 3328  ;;  %vm271_vm3 = vsmask.f32 7440  ;;  %vm491_vm4 = vcmask 23552  }
  0x17   : > { %v3088_v4 = vsel %vm517_vm1, %v518_v3, 0  ;;  %s3090_s11 = scalar_lea.vmem %s230_s7, %s2882_s10  ;;  %v2604_v5 = vld [vmem:[%s3907_s1 + $0x4] sm:$0x3]  ;;  %v2631_v6 = vld [vmem:[%s3907_s1 + $0x6] sm:$0x3]  ;;  %vm3127_vm5 = vmor %vm270_vm2, %vm271_vm3  ;;  %vm712_vm6 = vcmask 1042432  }
  0x18   : > { %v521_v7 = vand.u32 %v2547_v1, %v3088_v4  ;;  %v249_v8 = vld [vmem:[%s3090_s11 + $0x18] sm:$0xf]  ;;  %v3101_v9 = vld [vmem:[%s3090_s11 + $0x1c] sm:$0xf]  ;;  %v3104_v10 = vld [vmem:[%s3090_s11 + $0x20] sm:$0x1]  ;;  %v822_v11 = vand.u32 %v2604_v5, %v3088_v4  ;;  %v976_v12 = vand.u32 %v2631_v6, %v3088_v4 }
  0x19   : > { %v322_v13 = vshrl.u32 %v249_v8, 16  ;;  %v325_v14 = vshll.u32 %v249_v8, 16  ;;  %v331_v15 = vshll.u32 %v3101_v9, 16  ;;  %v335_v16 = vshrl.u32 %v3101_v9, 16  ;;  %v253_v17 = vld [vmem:[%s3090_s11 + $0x30] sm:$0xf] }
  0x1a   : > { %2915 = vmatpush.bf16.msra.mxu1 %v521_v7  ;;  %2916 = vmatpush.bf16.msra.mxu2 %v521_v7  ;;  %v341_v18 = vshll.u32 %v3104_v10, 16  ;;  %v3113_v19 = vld [vmem:[%s3090_s11 + $0x34] sm:$0xf]  ;;  %v3116_v20 = vld [vmem:[%s3090_s11 + $0x38] sm:$0x1]  ;;  %v370_v21 = vshrl.u32 %v253_v17, 16 }
  0x1b   : > { %2917 = vmatpush.bf16.msra.mxu3 %v521_v7  ;;  %530 = vmatpush.bf16.msra.mxu0 %v521_v7  ;;  %v324_v22 = vrot.slane %v322_v13, 4  ;;  %v327_v23 = vrot.slane %v325_v14, 5  ;;  %v333_v24 = vrot.slane %v331_v15, 5  ;;  %v337_v25 = vrot.slane %v335_v16, 4  ;;  %v257_v26 = vld [vmem:[%s3090_s11 + $0x48] sm:$0xf] }
  0x1c   : > { %v343_v27 = vrot.slane %v341_v18, 5  ;;  %v372_v28 = vrot.slane %v370_v21, 4  ;;  %v373_v29 = vshll.u32 %v253_v17, 16  ;;  %v379_v30 = vshll.u32 %v3113_v19, 16  ;;  %v3123_v35 = vld [vmem:[%s3090_s11 + $0x4c] sm:$0xf] }
  0x1d   : > { %v328_v31 = vor.u32 %v327_v23, %v324_v22  ;;  %v338_v32 = vor.u32 %v337_v25, %v333_v24  ;;  %v383_v33 = vshrl.u32 %v3113_v19, 16  ;;  %v389_v34 = vshll.u32 %v3116_v20, 16  ;;  %v3132_v46 = vld [vmem:[%s3090_s11 + $0x50] sm:$0x1]  ;;  %v245_v54 = vld [vmem:[%s3090_s11] sm:$0xf] }
  0x1e   : > { %831 = vmatpush.bf16.msrb.mxu2 %v822_v11  ;;  %v375_v37 = vrot.slane %v373_v29, 5  ;;  %v381_v38 = vrot.slane %v379_v30, 5  ;;  %v418_v39 = vshrl.u32 %v257_v26, 16  ;;  %v421_v40 = vshll.u32 %v257_v26, 16  ;;  %v3145_v2 = vld [vmem:[%s3090_s11 + $0x4] sm:$0xf] }
  0x1f   : > { %985 = vmatpush.bf16.msrb.mxu3 %v976_v12  ;;  %v329_v41 = vrot.slane %v328_v31, 4  ;;  %v339_v42 = vrot.slane %v338_v32, 4  ;;  %v385_v43 = vrot.slane %v383_v33, 4  ;;  %v391_v44 = vrot.slane %v389_v34, 5  ;;  %v3150_v11 = vld [vmem:[%s3090_s11 + $0x8] sm:$0x1] }
  0x20   : > { %v376_v45 = vor.u32 %v375_v37, %v372_v28  ;;  %v420_v47 = vrot.slane %v418_v39, 4  ;;  %v423_v48 = vrot.slane %v421_v40, 5  ;;  %v427_v49 = vshll.u32 %v3123_v35, 16  ;;  %v261_v16 = vld [vmem:[%s3907_s1] sm:$0x3]  ;;  %p2847_p7 = scmp.ne.s32.totalorder %s2992_s18, 1 }
  0x21   : > { %v334_v50 = vsel %vm3127_vm5, %v329_v41, %v333_v24  ;;  %v344_v51 = vsel %vm3127_vm5, %v339_v42, %v343_v27  ;;  %v386_v52 = vor.u32 %v385_v43, %v381_v38  ;;  %v431_v53 = vshrl.u32 %v3123_v35, 16  ;;  %v2696_v17 = vld [vmem:[%s3907_s1 + $0x8] sm:$0x3]  ;;  %v251_v24 = vld [vmem:[%s3090_s11 + $0x24] sm:$0xf] }
  0x22   : > { %v471_v55 = vunpack.c.l.b16 %v334_v50  ;;  %v472_v56 = vunpack.c.l.b16 %v344_v51  ;;  %v377_v57 = vrot.slane %v376_v45, 4  ;;  %v424_v58 = vor.u32 %v423_v48, %v420_v47  ;;  %v3167_v29 = vld [vmem:[%s3090_s11 + $0x28] sm:$0xf]  ;;  %v3173_v34 = vld [vmem:[%s3090_s11 + $0x2c] sm:$0x1] }
  0x23   : > { %v387_v59 = vrot.slane %v386_v52, 4  ;;  %v429_v60 = vrot.slane %v427_v49, 5  ;;  %v433_v61 = vrot.slane %v431_v53, 4  ;;  %v437_v62 = vshll.u32 %v3132_v46, 16  ;;  %v255_v45 = vld [vmem:[%s3090_s11 + $0x3c] sm:$0xf] }
  0x24   : > { %v485_v63 = vpack.c.b16 %v472_v56, %v471_v55  ;;  %v382_v0 = vsel %vm3127_vm5, %v377_v57, %v381_v38  ;;  %v425_v1 = vrot.slane %v424_v58, 4  ;;  %v274_v3 = vshrl.u32 %v245_v54, 16  ;;  %v3182_v55 = vld [vmem:[%s3090_s11 + $0x40] sm:$0xf] }
  0x25   : > { %v392_v5 = vsel %vm3127_vm5, %v387_v59, %v391_v44  ;;  %v475_v6 = vunpack.c.l.b16 %v382_v0  ;;  %v434_v7 = vor.u32 %v433_v61, %v429_v60  ;;  %v439_v8 = vrot.slane %v437_v62, 5  ;;  %v3188_v59 = vld [vmem:[%s3090_s11 + $0x44] sm:$0x1] }
  0x26   : > { %2550 = vmatmul.msk.bf16.vlgmr.msra.gmra.mxu1 %vm491_vm4, %v485_v63  ;;  %v476_v12 = vunpack.c.l.b16 %v392_v5  ;;  %v430_v13 = vsel %vm3127_vm5, %v425_v1, %v429_v60  ;;  %v276_v14 = vrot.slane %v274_v3, 4  ;;  %v277_v15 = vshll.u32 %v245_v54, 16  ;;  %v259_v1 = vld [vmem:[%s3090_s11 + $0x54] sm:$0xf] }
  0x27   : > { %v435_v18 = vrot.slane %v434_v7, 4  ;;  %v479_v21 = vunpack.c.l.b16 %v430_v13  ;;  %v283_v22 = vshll.u32 %v3145_v2, 16  ;;  %v287_v23 = vshrl.u32 %v3145_v2, 16 }
  0x28   : > { %v487_v25 = vpack.c.b16 %v476_v12, %v475_v6  ;;  %v279_v26 = vrot.slane %v277_v15, 5  ;;  %v293_v27 = vshll.u32 %v3150_v11, 16  ;;  %v720_v28 = vrot.slane %v3150_v11, 5 }
  0x29   : > { %v440_v30 = vsel %vm3127_vm5, %v435_v18, %v439_v8  ;;  %v285_v31 = vrot.slane %v283_v22, 5  ;;  %v289_v32 = vrot.slane %v287_v23, 4  ;;  %v637_v33 = vand.u32 %v3088_v4, %v261_v16  ;;  %v3197_v18 = vld [vmem:[%s3090_s11 + $0x58] sm:$0xf] }
  0x2a   : > { %2552 = vmatmul.msk.bf16.vlgmr.msra.gmra.mxu2 %vm491_vm4, %v487_v25  ;;  %v480_v37 = vunpack.c.l.b16 %v440_v30  ;;  %v280_v38 = vor.u32 %v279_v26, %v276_v14  ;;  %v295_v39 = vrot.slane %v293_v27, 5  ;;  %v1310_v40 = vand.u32 %v2696_v17, %v3088_v4  ;;  %v3202_v26 = vld [vmem:[%s3090_s11 + $0x5c] sm:$0x1]  ;;  %v247_v27 = vld [vmem:[%s3090_s11 + $0xc] sm:$0xf] }
  0x2b   : > { %v290_v41 = vor.u32 %v289_v32, %v285_v31  ;;  %646 = vmatpush.bf16.msrb.mxu1 %v637_v33  ;;  %v346_v42 = vshrl.u32 %v251_v24, 16  ;;  %v349_v43 = vshll.u32 %v251_v24, 16  ;;  %v355_v44 = vshll.u32 %v3167_v29, 16 }
  0x2c   : > { %v489_v47 = vpack.c.b16 %v480_v37, %v479_v21  ;;  %v281_v48 = vrot.slane %v280_v38, 4  ;;  %1319 = vmatpush.bf16.msrb.mxu0 %v1310_v40  ;;  %v359_v49 = vshrl.u32 %v3167_v29, 16  ;;  %v365_v50 = vshll.u32 %v3173_v34, 16 }
  0x2d   : > { %v291_v51 = vrot.slane %v290_v41, 4  ;;  %v348_v52 = vrot.slane %v346_v42, 4  ;;  %v351_v53 = vrot.slane %v349_v43, 5  ;;  %v357_v54 = vrot.slane %v355_v44, 5  ;;  %v3212_v44 = vld [vmem:[%s3090_s11 + $0x10] sm:$0xf] }
  0x2e   : > { %2554 = vmatmul.msk.bf16.vlgmr.msra.gmra.mxu3 %vm491_vm4, %v489_v47  ;;  %v286_v56 = vsel %vm3127_vm5, %v281_v48, %v285_v31  ;;  %v361_v57 = vrot.slane %v359_v49, 4  ;;  %v367_v58 = vrot.slane %v365_v50, 5  ;;  %v394_v60 = vshrl.u32 %v255_v45, 16 }
  0x2f   : > { %v296_v61 = vsel %vm3127_vm5, %v291_v51, %v295_v39  ;;  %v467_v62 = vunpack.c.l.b16 %v286_v56  ;;  %v352_v63 = vor.u32 %v351_v53, %v348_v52  ;;  %v397_v0 = vshll.u32 %v255_v45, 16  ;;  %v3217_v56 = vld [vmem:[%s3090_s11 + $0x14] sm:$0x1] }
  0x30   : > { %v468_v3 = vunpack.c.l.b16 %v296_v61  ;;  %v362_v5 = vor.u32 %v361_v57, %v357_v54  ;;  %v396_v6 = vrot.slane %v394_v60, 4  ;;  %v403_v7 = vshll.u32 %v3182_v55, 16 }
  0x31   : > { %v353_v8 = vrot.slane %v352_v63, 4  ;;  %v399_v12 = vrot.slane %v397_v0, 5  ;;  %v407_v13 = vshrl.u32 %v3182_v55, 16  ;;  %v413_v14 = vshll.u32 %v3188_v59, 16 }
  0x32   : > { %v483_v15 = vpack.c.b16 %v468_v3, %v467_v62  ;;  %v363_v16 = vrot.slane %v362_v5, 4  ;;  %v405_v17 = vrot.slane %v403_v7, 5  ;;  %v442_v21 = vshrl.u32 %v259_v1, 16  ;;  %v688_v7 = vld [vmem:[%s3090_s11] sm:$0xe] }
  0x33   : > { %v358_v22 = vsel %vm3127_vm5, %v353_v8, %v357_v54  ;;  %v400_v23 = vor.u32 %v399_v12, %v396_v6  ;;  %v409_v24 = vrot.slane %v407_v13, 4  ;;  %v415_v25 = vrot.slane %v413_v14, 5 }
  0x34   : > { %2548 = vmatmul.msk.bf16.vlgmr.msra.gmra.mxu0 %vm491_vm4, %v483_v15  ;;  %v368_v30 = vsel %vm3127_vm5, %v363_v16, %v367_v58  ;;  %v473_v31 = vunpack.c.l.b16 %v358_v22  ;;  %v444_v32 = vrot.slane %v442_v21, 4  ;;  %v445_v33 = vshll.u32 %v259_v1, 16  ;;  %v2748_v15 = vld [vmem:[%s3907_s1 + $0xc] sm:$0x3] }
  0x35   : > { %v474_v37 = vunpack.c.l.b16 %v368_v30  ;;  %v401_v38 = vrot.slane %v400_v23, 4  ;;  %v410_v39 = vor.u32 %v409_v24, %v405_v17  ;;  %v451_v40 = vshll.u32 %v3197_v18, 16  ;;  %v2672_v16 = vld [vmem:[%s3090_s11 + $0xc] sm:$0xf] }
  0x36   : > { %v447_v41 = vrot.slane %v445_v33, 5  ;;  %v455_v42 = vshrl.u32 %v3197_v18, 16  ;;  %v461_v43 = vshll.u32 %v3202_v26, 16  ;;  %v298_v45 = vshrl.u32 %v247_v27, 16 }
  0x37   : > { %v486_v47 = vpack.c.b16 %v474_v37, %v473_v31  ;;  %v406_v48 = vsel %vm3127_vm5, %v401_v38, %v405_v17  ;;  %v411_v49 = vrot.slane %v410_v39, 4  ;;  %v453_v50 = vrot.slane %v451_v40, 5  ;;  %v3243_v40 = vld [vmem:[%s3090_s11 + $0x10] sm:$0xf] }
  0x38   : > { %v477_v51 = vunpack.c.l.b16 %v406_v48  ;;  %v448_v52 = vor.u32 %v447_v41, %v444_v32  ;;  %v457_v53 = vrot.slane %v455_v42, 4  ;;  %v463_v54 = vrot.slane %v461_v43, 5 }
  0x39   : > { %2551 = vmatmul.msk.bf16.gmra.mxu1 %vm491_vm4, %v486_v47  ;;  %v416_v57 = vsel %vm3127_vm5, %v411_v49, %v415_v25  ;;  %v300_v58 = vrot.slane %v298_v45, 4  ;;  %v301_v60 = vshll.u32 %v247_v27, 16  ;;  %v307_v61 = vshll.u32 %v3212_v44, 16  ;;  %v2813_v47 = vld [vmem:[%s3907_s1 + $0xe] sm:$0x3] }
  0x3a   : > { %v478_v62 = vunpack.c.l.b16 %v416_v57  ;;  %v449_v63 = vrot.slane %v448_v52, 4  ;;  %v458_v0 = vor.u32 %v457_v53, %v453_v50  ;;  %v311_v1 = vshrl.u32 %v3212_v44, 16 }
  0x3b   : > { %v303_v3 = vrot.slane %v301_v60, 5  ;;  %v309_v5 = vrot.slane %v307_v61, 5  ;;  %v317_v6 = vshll.u32 %v3217_v56, 16  ;;  %vm713_vm7 = vcmask 1046532   ;;  %v2838_v60 = vld [vmem:[%s3907_s1 + $0x10] sm:$0x3] }
  0x3c   : > { %v488_v8 = vpack.c.b16 %v478_v62, %v477_v51  ;;  %v454_v12 = vsel %vm3127_vm5, %v449_v63, %v453_v50  ;;  %v459_v13 = vrot.slane %v458_v0, 4  ;;  %v313_v14 = vrot.slane %v311_v1, 4  ;;  %vm3237_vm8 = vmor %vm712_vm6, %vm713_vm7 }
  0x3d   : > { %v481_v17 = vunpack.c.l.b16 %v454_v12  ;;  %v304_v21 = vor.u32 %v303_v3, %v300_v58  ;;  %v319_v22 = vrot.slane %v317_v6, 5  ;;  %v2596_v25 = vrot.slane %v688_v7, 9  ;;  %v2721_v58 = vld [vmem:[%s3907_s1 + $0xa] sm:$0x3] }
  0x3e   : > { %2553 = vmatmul.msk.bf16.gmra.mxu2 %vm491_vm4, %v488_v8  ;;  %v464_v23 = vsel %vm3127_vm5, %v459_v13, %v463_v54  ;;  %v314_v24 = vor.u32 %v313_v14, %v309_v5  ;;  %v717_v27 = vrot.slane %v3145_v2, 5  ;;  %v1670_v33 = vand.u32 %v2748_v15, %v3088_v4  ;;  %v3248_v2 = vld [vmem:[%s3090_s11 + $0x14] sm:$0x1]  ;;  %v2675_v13 = vld [vmem:[%s3090_s11 + $0x18] sm:$0xf] }
  0x3f   : > { %v482_v30 = vunpack.c.l.b16 %v464_v23  ;;  %v305_v31 = vrot.slane %v304_v21, 4  ;;  %v1068_v37 = vshrl.u32 %v2672_v16, 16  ;;  %v1071_v41 = vshll.u32 %v2672_v16, 16  ;;  %v3279_v16 = vld [vmem:[%s3090_s11 + $0x1c] sm:$0xf] }
  0x40   : > { %v315_v38 = vrot.slane %v314_v24, 4  ;;  %v719_v39 = vrot.slane %v717_v27, 4  ;;  %1679 = vmatpush.bf16.msra.mxu2 %v1670_v33  ;;  %v718_v50 = vsel %vm3237_vm8, %v2596_v25, %v717_v27  ;;  %v1077_v54 = vshll.u32 %v3243_v40, 16 }
  0x41   : > { %v490_v42 = vpack.c.b16 %v482_v30, %v481_v17  ;;  %v310_v43 = vsel %vm3127_vm5, %v305_v31, %v309_v5  ;;  %v1070_v45 = vrot.slane %v1068_v37, 4  ;;  %v1073_v51 = vrot.slane %v1071_v41, 5  ;;  %v690_v17 = vld [vmem:[%s3090_s11 + $0x18] sm:$0xe] }
  0x42   : > { %v320_v48 = vsel %vm3127_vm5, %v315_v38, %v319_v22  ;;  %v469_v49 = vunpack.c.l.b16 %v310_v43  ;;  %v721_v53 = vsel %vm3237_vm8, %v719_v39, %v720_v28  ;;  %v1081_v57 = vshrl.u32 %v3243_v40, 16  ;;  %v2883_v28 = vld [vmem:[%s3090_s11] sm:$0xff]  ;;  %v689_v22 = vld [vmem:[%s3090_s11 + $0xc] sm:$0xe] }
  0x43   : > { %2555 = vmatmul.msk.bf16.gmra.mxu3 %vm491_vm4, %v490_v42  ;;  %v470_v52 = vunpack.c.l.b16 %v320_v48  ;;  %v1074_v61 = vor.u32 %v1073_v51, %v1070_v45  ;;  %v1087_v62 = vshll.u32 %v3248_v2, 16  ;;  %v2004_v11 = vand.u32 %v2813_v47, %v3088_v4  ;;  %v2891_v45 = vld [vmem:[%s3090_s11 + $0xc] sm:$0xff] }
  0x44   : > { %v1079_v0 = vrot.slane %v1077_v54, 5  ;;  %v1083_v1 = vrot.slane %v1081_v57, 4  ;;  %v773_v3 = vunpack.c.l.b16 %v718_v50  ;;  %v774_v5 = vunpack.c.l.b16 %v721_v53  ;;  %v3298_v53 = vld [vmem:[%s3090_s11 + $0x20] sm:$0x1] }
  0x45   : > { %v484_v63 = vpack.c.b16 %v470_v52, %v469_v49  ;;  %2013 = vmatpush.bf16.msra.mxu3 %v2004_v11  ;;  %v1516_v6 = vand.u32 %v2721_v58, %v3088_v4  ;;  %v2210_v7 = vand.u32 %v2838_v60, %v3088_v4  ;;  %v1075_v8 = vrot.slane %v1074_v61, 4 }
  0x46   : > { %v1084_v12 = vor.u32 %v1083_v1, %v1079_v0  ;;  %v1089_v14 = vrot.slane %v1087_v62, 5  ;;  %v789_v21 = vpack.c.b16 %v774_v5, %v773_v3  ;;  %v724_v23 = vrot.slane %v3212_v44, 5  ;;  %v2678_v3 = vld [vmem:[%s3090_s11 + $0x24] sm:$0xf] }
  0x47   : > { %2549 = vmatmul.msk.bf16.gmra.mxu0 %vm491_vm4, %v484_v63  ;;  %1525 = vmatpush.bf16.msra.mxu1 %v1516_v6  ;;  %v1092_v4 = vshrl.u32 %v2675_v13, 16  ;;  %v1080_v24 = vsel %vm3127_vm5, %v1075_v8, %v1079_v0  ;;  %v1095_v25 = vshll.u32 %v2675_v13, 16  ;;  %v1101_v30 = vshll.u32 %v3279_v16, 16  ;;  %v2884_v63 = vld [vmem:[%s3090_s11 + $0xc] sm:$0xff]  ;;  %v691_v8 = vld [vmem:[%s3090_s11 + $0x24] sm:$0xe] }
  0x48   : > { %2219 = vmatpush.bf16.msra.mxu0 %v2210_v7  ;;  %v1085_v15 = vrot.slane %v1084_v12, 4  ;;  %v1105_v31 = vshrl.u32 %v3279_v16, 16  ;;  %v2598_v33 = vrot.slane %v690_v17, 9  ;;  %v2597_v37 = vrot.slane %v689_v22, 9  ;;  %v3312_v7 = vld [vmem:[%s3090_s11 + $0x28] sm:$0xf] }
  0x49   : > { %2588 = vmatmul.msk.bf16.vlgmr.msrb.gmra.mxu1 %vm491_vm4, %v2883_v28  ;;  %v731_v38 = vrot.slane %v3101_v9, 5  ;;  %v734_v44 = vrot.slane %v3104_v10, 5  ;;  %v1261_v39 = vunpack.c.l.b16 %v1080_v24  ;;  %v726_v41 = vrot.slane %v724_v23, 4 }
  0x4a   : > { %v1090_v27 = vsel %vm3127_vm5, %v1085_v15, %v1089_v14  ;;  %v727_v42 = vrot.slane %v3217_v56, 5  ;;  %v1094_v43 = vrot.slane %v1092_v4, 4  ;;  %v1097_v48 = vrot.slane %v1095_v25, 5 }
  0x4b   : > { %v1262_v47 = vunpack.c.l.b16 %v1090_v27  ;;  %v732_v49 = vsel %vm3237_vm8, %v2598_v33, %v731_v38  ;;  %v733_v50 = vrot.slane %v731_v38, 4  ;;  %v1103_v51 = vrot.slane %v1101_v30, 5 }
  0x4c   : > { %v1107_v52 = vrot.slane %v1105_v31, 4  ;;  %v777_v9 = vunpack.c.l.b16 %v732_v49  ;;  %v725_v57 = vsel %vm3237_vm8, %v2597_v37, %v724_v23  ;;  %v728_v58 = vsel %vm3237_vm8, %v726_v41, %v727_v42  ;;  %v2892_v37 = vld [vmem:[%s3090_s11 + $0x18] sm:$0xff]  ;;  %v3331_v42 = vld [vmem:[%s3090_s11 + $0x2c] sm:$0x1] }
  0x4d   : > { %v735_v10 = vsel %vm3237_vm8, %v733_v50, %v734_v44  ;;  %v1277_v56 = vpack.c.b16 %v1262_v47, %v1261_v39  ;;  %v1098_v60 = vor.u32 %v1097_v48, %v1094_v43  ;;  %v1111_v62 = vshll.u32 %v3298_v53, 16  ;;  %v2885_v50 = vld [vmem:[%s3090_s11 + $0x18] sm:$0xff] }
  0x4e   : > { %2605 = vmatmul.msk.bf16.vlgmr.msrb.gmra.mxu2 %vm491_vm4, %v789_v21  ;;  %v778_v54 = vunpack.c.l.b16 %v735_v10  ;;  %v1108_v61 = vor.u32 %v1107_v52, %v1103_v51  ;;  %v775_v28 = vunpack.c.l.b16 %v725_v57  ;;  %v776_v0 = vunpack.c.l.b16 %v728_v58  ;;  %v2681_v10 = vld [vmem:[%s3090_s11 + $0x30] sm:$0xf] }
  0x4f   : > { %v1099_v1 = vrot.slane %v1098_v60, 4  ;;  %v1113_v6 = vrot.slane %v1111_v62, 5  ;;  %v738_v12 = vrot.slane %v3167_v29, 5  ;;  %v741_v13 = vrot.slane %v3173_v34, 5 }
  0x50   : > { %v791_v11 = vpack.c.b16 %v778_v54, %v777_v9  ;;  %v1109_v5 = vrot.slane %v1108_v61, 4  ;;  %v790_v14 = vpack.c.b16 %v776_v0, %v775_v28  ;;  %v1116_v15 = vshrl.u32 %v2678_v3, 16  ;;  %v3340_v54 = vld [vmem:[%s3090_s11 + $0x34] sm:$0xf] }
  0x51   : > { %v1119_v17 = vshll.u32 %v2678_v3, 16  ;;  %v2599_v21 = vrot.slane %v691_v8, 9  ;;  %v1104_v22 = vsel %vm3127_vm5, %v1099_v1, %v1103_v51  ;;  %v1125_v23 = vshll.u32 %v3312_v7, 16  ;;  %v3351_v8 = vld [vmem:[%s3090_s11 + $0x38] sm:$0x1] }
  0x52   : > { %v1129_v4 = vshrl.u32 %v3312_v7, 16  ;;  %v740_v24 = vrot.slane %v738_v12, 4  ;;  %v1114_v25 = vsel %vm3127_vm5, %v1109_v5, %v1113_v6  ;;  %v1263_v30 = vunpack.c.l.b16 %v1104_v22 }
  0x53   : > { %2664 = vmatmul.msk.bf16.vlgmr.msrb.gmra.mxu3 %vm491_vm4, %v2891_v45  ;;  %v739_v29 = vsel %vm3237_vm8, %v2599_v21, %v738_v12  ;;  %v1118_v31 = vrot.slane %v1116_v15, 4  ;;  %v1264_v38 = vunpack.c.l.b16 %v1114_v25  ;;  %v1121_v44 = vrot.slane %v1119_v17, 5  ;;  %v2684_v17 = vld [vmem:[%s3090_s11 + $0x3c] sm:$0xf]  ;;  %v3359_v21 = vld [vmem:[%s3090_s11 + $0x40] sm:$0xf] }
  0x54   : > { %v742_v34 = vsel %vm3237_vm8, %v740_v24, %v741_v13  ;;  %v779_v27 = vunpack.c.l.b16 %v739_v29  ;;  %v1127_v39 = vrot.slane %v1125_v23, 5  ;;  %v1131_v41 = vrot.slane %v1129_v4, 4  ;;  %v692_v24 = vld [vmem:[%s3090_s11 + $0x30] sm:$0xe] }
  0x55   : > { %v780_v33 = vunpack.c.l.b16 %v742_v34  ;;  %v1278_v45 = vpack.c.b16 %v1264_v38, %v1263_v30  ;;  %v1122_v47 = vor.u32 %v1121_v44, %v1118_v31  ;;  %v1135_v49 = vshll.u32 %v3331_v42, 16 }
  0x56   : > { %v1132_v48 = vor.u32 %v1131_v41, %v1127_v39  ;;  %v1140_v58 = vshrl.u32 %v2681_v10, 16  ;;  %v1143_v60 = vshll.u32 %v2681_v10, 16  ;;  %v1149_v61 = vshll.u32 %v3340_v54, 16 }
  0x57   : > { %2697 = vmatmul.msk.bf16.vlgmr.msrb.gmra.mxu0 %vm491_vm4, %v1277_v56  ;;  %v792_v43 = vpack.c.b16 %v780_v33, %v779_v27  ;;  %v1123_v51 = vrot.slane %v1122_v47, 4  ;;  %v1137_v9 = vrot.slane %v1135_v49, 5  ;;  %v1153_v62 = vshrl.u32 %v3340_v54, 16 }
  0x58   : > { %v1133_v52 = vrot.slane %v1132_v48, 4  ;;  %v1142_v1 = vrot.slane %v1140_v58, 4  ;;  %v1145_v3 = vrot.slane %v1143_v60, 5  ;;  %v1151_v5 = vrot.slane %v1149_v61, 5 }
  0x59   : > { %2589 = vmatmul.msk.bf16.gmra.mxu1 %vm491_vm4, %v2884_v63  ;;  %v1128_v56 = vsel %vm3127_vm5, %v1123_v51, %v1127_v39  ;;  %v2893_v63 = vld [vmem:[%s3090_s11 + $0x24] sm:$0xff]  ;;  %v1155_v6 = vrot.slane %v1153_v62, 4  ;;  %v1159_v15 = vshll.u32 %v3351_v8, 16  ;;  %v1164_v25 = vshrl.u32 %v2684_v17, 16 }
  0x5a   : > { %v1138_v57 = vsel %vm3127_vm5, %v1133_v52, %v1137_v9  ;;  %v1265_v28 = vunpack.c.l.b16 %v1128_v56  ;;  %v1146_v13 = vor.u32 %v1145_v3, %v1142_v1  ;;  %v1167_v29 = vshll.u32 %v2684_v17, 16 }
  0x5b   : > { %v1266_v0 = vunpack.c.l.b16 %v1138_v57  ;;  %v1161_v4 = vrot.slane %v1159_v15, 5  ;;  %v1173_v34 = vshll.u32 %v3359_v21, 16  ;;  %v1177_v27 = vshrl.u32 %v3359_v21, 16  ;;  %v2887_v57 = vld [vmem:[%s3090_s11 + $0x30] sm:$0xff] }
  0x5c   : > { %v1147_v22 = vrot.slane %v1146_v13, 4  ;;  %v745_v30 = vrot.slane %v3113_v19, 5  ;;  %v1166_v38 = vrot.slane %v1164_v25, 4  ;;  %v1169_v44 = vrot.slane %v1167_v29, 5 }
  0x5d   : > { %v1279_v12 = vpack.c.b16 %v1266_v0, %v1265_v28  ;;  %v1175_v39 = vrot.slane %v1173_v34, 5  ;;  %v1179_v41 = vrot.slane %v1177_v27, 4  ;;  %v748_v19 = vrot.slane %v3116_v20, 5  ;;  %v3386_v28 = vld [vmem:[%s3090_s11 + $0x4c] sm:$0xf] }
  0x5e   : > { %2606 = vmatmul.msk.bf16.gmra.mxu2 %vm491_vm4, %v790_v14  ;;  %v1156_v14 = vor.u32 %v1155_v6, %v1151_v5  ;;  %v1152_v31 = vsel %vm3127_vm5, %v1147_v22, %v1151_v5  ;;  %v747_v49 = vrot.slane %v745_v30, 4  ;;  %v1170_v52 = vor.u32 %v1169_v44, %v1166_v38  ;;  %v693_v6 = vld [vmem:[%s3090_s11 + $0x3c] sm:$0xe]  ;;  %v3401_v27 = vld [vmem:[%s3090_s11 + $0x50] sm:$0x1] }
  0x5f   : > { %v1267_v47 = vunpack.c.l.b16 %v1152_v31  ;;  %v752_v5 = vrot.slane %v3182_v55, 5  ;;  %v1201_v15 = vshrl.u32 %v3386_v28, 16  ;;  %v2601_v22 = vrot.slane %v693_v6, 9  ;;  %v2888_v44 = vld [vmem:[%s3090_s11 + $0x3c] sm:$0xff] }
  0x60   : > { %v1157_v23 = vrot.slane %v1156_v14, 4  ;;  %v749_v56 = vsel %vm3237_vm8, %v747_v49, %v748_v19  ;;  %v1171_v60 = vrot.slane %v1170_v52, 4  ;;  %v1197_v14 = vshll.u32 %v3386_v28, 16  ;;  %v2690_v49 = vld [vmem:[%s3090_s11 + $0x54] sm:$0xf] }
  0x61   : > { %v782_v58 = vunpack.c.l.b16 %v749_v56  ;;  %v1203_v34 = vrot.slane %v1201_v15, 4  ;;  %v753_v31 = vsel %vm3237_vm8, %v2601_v22, %v752_v5  ;;  %v1207_v38 = vshll.u32 %v3401_v27, 16  ;;  %v3414_v19 = vld [vmem:[%s3090_s11 + $0x58] sm:$0xf] }
  0x62   : > { %v1162_v33 = vsel %vm3127_vm5, %v1157_v23, %v1161_v4  ;;  %v1176_v1 = vsel %vm3127_vm5, %v1171_v60, %v1175_v39  ;;  %v754_v23 = vrot.slane %v752_v5, 4  ;;  %v755_v4 = vrot.slane %v3188_v59, 5 }
  0x63   : > { %2665 = vmatmul.msk.bf16.gmra.mxu3 %vm491_vm4, %v2892_v37  ;;  %v2600_v37 = vrot.slane %v692_v24, 9  ;;  %v1268_v48 = vunpack.c.l.b16 %v1162_v33  ;;  %v2895_v24 = vld [vmem:[%s3090_s11 + $0x3c] sm:$0xff]  ;;  %v1199_v29 = vrot.slane %v1197_v14, 5  ;;  %v1212_v52 = vshrl.u32 %v2690_v49, 16 }
  0x64   : > { %v756_v33 = vsel %vm3237_vm8, %v754_v23, %v755_v4  ;;  %v1215_v56 = vshll.u32 %v2690_v49, 16  ;;  %v2889_v23 = vld [vmem:[%s3090_s11 + $0x48] sm:$0xff] }
  0x65   : > { %v746_v51 = vsel %vm3237_vm8, %v2600_v37, %v745_v30  ;;  %v1280_v10 = vpack.c.b16 %v1268_v48, %v1267_v47  ;;  %v1204_v59 = vor.u32 %v1203_v34, %v1199_v29  ;;  %v1209_v48 = vrot.slane %v1207_v38, 5 }
  0x66   : > { %v781_v20 = vunpack.c.l.b16 %v746_v51  ;;  %v1217_v5 = vrot.slane %v1215_v56, 5  ;;  %v766_v38 = vrot.slane %v3197_v18, 5  ;;  %v769_v56 = vrot.slane %v3202_v26, 5 }
  0x67   : > { %2698 = vmatmul.msk.bf16.gmra.mxu0 %vm491_vm4, %v1278_v45  ;;  %v2894_v45 = vld [vmem:[%s3090_s11 + $0x30] sm:$0xff]  ;;  %v1205_v47 = vrot.slane %v1204_v59, 4 }
  0x68   : > { %v793_v0 = vpack.c.b16 %v782_v58, %v781_v20  ;;  %v1221_v20 = vshll.u32 %v3414_v19, 16  ;;  %v1225_v58 = vshrl.u32 %v3414_v19, 16 }
  0x69   : > { %2590 = vmatmul.msk.bf16.gmra.mxu1 %vm491_vm4, %v2885_v50  ;;  %v3374_v50 = vld [vmem:[%s3090_s11 + $0x44] sm:$0x1] }
  0x6a   : > { %v1183_v9 = vshll.u32 %v3374_v50, 16  ;;  %v1227_v6 = vrot.slane %v1225_v58, 4 }
  0x6c   : > { %v1185_v62 = vrot.slane %v1183_v9, 5  ;;  %v1210_v9 = vsel %vm3127_vm5, %v1205_v47, %v1209_v48 }
  0x6e   : > { %2607 = vmatmul.msk.bf16.gmra.mxu2 %vm491_vm4, %v791_v11  ;;  %v2886_v11 = vld [vmem:[%s3090_s11 + $0x24] sm:$0xff] }
  0x73   : > { %2666 = vmatmul.msk.bf16.gmra.mxu3 %vm491_vm4, %v2893_v63  ;;  %v2687_v63 = vld [vmem:[%s3090_s11 + $0x48] sm:$0xf] }
  0x74   : > { %v1191_v13 = vshll.u32 %v2687_v63, 16 }
  0x76   : > { %v1193_v55 = vrot.slane %v1191_v13, 5 }
  0x77   : > { %2699 = vmatmul.msk.bf16.gmra.mxu0 %vm491_vm4, %v1279_v12  ;;  %v1188_v12 = vshrl.u32 %v2687_v63, 16  ;;  %v2896_v63 = vld [vmem:[%s3090_s11 + $0x48] sm:$0xff] }
  0x79   : > { %2591 = vmatmul.msk.bf16.gmra.mxu1 %vm491_vm4, %v2886_v11  ;;  %v1269_v11 = vunpack.c.l.b16 %v1176_v1  ;;  %v1190_v25 = vrot.slane %v1188_v12, 4  ;;  %v3428_v12 = vld [vmem:[%s3090_s11 + $0x5c] sm:$0x1] }
  0x7a   : > { %v1231_v22 = vshll.u32 %v3428_v12, 16 }
  0x7b   : > { %v1194_v37 = vor.u32 %v1193_v55, %v1190_v25  ;;  %v2693_v55 = vld [vmem:[%s3090_s11 + $0x60] sm:$0xf] }
  0x7c   : > { %v1233_v34 = vrot.slane %v1231_v22, 5 }
  0x7e   : > { %2608 = vmatmul.msk.bf16.gmra.mxu2 %vm491_vm4, %v792_v43  ;;  %v1180_v43 = vor.u32 %v1179_v41, %v1175_v39  ;;  %v783_v39 = vunpack.c.l.b16 %v753_v31  ;;  %v784_v41 = vunpack.c.l.b16 %v756_v33  ;;  %v1236_v33 = vshrl.u32 %v2693_v55, 16 }
  0x80   : > { %v1181_v61 = vrot.slane %v1180_v43, 4  ;;  %v794_v51 = vpack.c.b16 %v784_v41, %v783_v39  ;;  %v695_v41 = vld [vmem:[%s3090_s11 + $0x54] sm:$0xe] }
  0x82   : > { %v1186_v3 = vsel %vm3127_vm5, %v1181_v61, %v1185_v62  ;;  %v1272_v61 = vunpack.c.l.b16 %v1210_v9  ;;  %v1214_v62 = vrot.slane %v1212_v52, 4  ;;  %v2603_v9 = vrot.slane %v695_v41, 9 }
  0x83   : > { %2667 = vmatmul.msk.bf16.gmra.mxu3 %vm491_vm4, %v2894_v45  ;;  %v1270_v17 = vunpack.c.l.b16 %v1186_v3  ;;  %v1195_v45 = vrot.slane %v1194_v37, 4  ;;  %v762_v3 = vrot.slane %v3132_v46, 5  ;;  %v1239_v37 = vshll.u32 %v2693_v55, 16 }
  0x85   : > { %v1281_v30 = vpack.c.b16 %v1270_v17, %v1269_v11  ;;  %v1200_v43 = vsel %vm3127_vm5, %v1195_v45, %v1199_v29  ;;  %v1218_v17 = vor.u32 %v1217_v5, %v1214_v62  ;;  %v1241_v52 = vrot.slane %v1239_v37, 5  ;;  %v2789_v5 = vld [vmem:[%s3090_s11 + $0x18] sm:$0xf] }
  0x86   : > { %v1271_v60 = vunpack.c.l.b16 %v1200_v43  ;;  %v2897_v43 = vld [vmem:[%s3090_s11 + $0x54] sm:$0xff] }
  0x87   : > { %2700 = vmatmul.msk.bf16.gmra.mxu0 %vm491_vm4, %v1280_v10  ;;  %v759_v10 = vrot.slane %v3123_v35, 5  ;;  %v1223_v35 = vrot.slane %v1221_v20, 5  ;;  %v1219_v25 = vrot.slane %v1218_v17, 4 }
  0x88   : > { %v1282_v13 = vpack.c.b16 %v1272_v61, %v1271_v60  ;;  %v3463_v60 = vld [vmem:[%s3090_s11 + $0x68] sm:$0x1] }
  0x89   : > { %2592 = vmatmul.msk.bf16.gmra.mxu1 %vm491_vm4, %v2887_v57  ;;  %v694_v57 = vld [vmem:[%s3090_s11 + $0x48] sm:$0xe]  ;;  %v761_v1 = vrot.slane %v759_v10, 4  ;;  %v1228_v46 = vor.u32 %v1227_v6, %v1223_v35  ;;  %v1224_v59 = vsel %vm3127_vm5, %v1219_v25, %v1223_v35  ;;  %v3475_v35 = vld [vmem:[%s3090_s11 + $0x1c] sm:$0xf]  ;;  %v2890_v6 = vld [vmem:[%s3090_s11 + $0x54] sm:$0xff] }
  0x8a   : > { %v1273_v49 = vunpack.c.l.b16 %v1224_v59  ;;  %v1771_v25 = vshll.u32 %v3475_v35, 16  ;;  %v1775_v55 = vshrl.u32 %v3475_v35, 16 }
  0x8b   : > { %v763_v11 = vsel %vm3237_vm8, %v761_v1, %v762_v3  ;;  %v1229_v29 = vrot.slane %v1228_v46, 4  ;;  %v1255_v3 = vshll.u32 %v3463_v60, 16  ;;  %v1411_v46 = vrot.slane %v3243_v40, 5 }
  0x8e   : > { %2609 = vmatmul.msk.bf16.gmra.mxu2 %vm491_vm4, %v793_v0  ;;  %v2602_v0 = vrot.slane %v694_v57, 9 }
  0x90   : > { %v760_v15 = vsel %vm3237_vm8, %v2602_v0, %v759_v10  ;;  %v768_v10 = vrot.slane %v766_v38, 4  ;;  %v767_v0 = vsel %vm3237_vm8, %v2603_v9, %v766_v38  ;;  %v1413_v38 = vrot.slane %v1411_v46, 4 }
  0x91   : > { %v785_v4 = vunpack.c.l.b16 %v760_v15  ;;  %v787_v15 = vunpack.c.l.b16 %v767_v0 }
  0x92   : > { %v770_v1 = vsel %vm3237_vm8, %v768_v10, %v769_v56  ;;  %v2898_v10 = vld [vmem:[%s3090_s11 + $0x60] sm:$0xff] }
  0x93   : > { %2668 = vmatmul.msk.bf16.gmra.mxu3 %vm491_vm4, %v2895_v24  ;;  %v786_v24 = vunpack.c.l.b16 %v763_v11  ;;  %v788_v11 = vunpack.c.l.b16 %v770_v1 }
  0x95   : > { %v795_v31 = vpack.c.b16 %v786_v24, %v785_v4  ;;  %v1762_v4 = vshrl.u32 %v2789_v5, 16  ;;  %v1765_v24 = vshll.u32 %v2789_v5, 16  ;;  %v796_v40 = vpack.c.b16 %v788_v11, %v787_v15 }
  0x97   : > { %2701 = vmatmul.msk.bf16.gmra.mxu0 %vm491_vm4, %v1281_v30  ;;  %v3443_v30 = vld [vmem:[%s3090_s11 + $0x64] sm:$0xf]  ;;  %v1767_v41 = vrot.slane %v1765_v24, 5 }
  0x98   : > { %v1245_v45 = vshll.u32 %v3443_v30, 16  ;;  %v1249_v47 = vshrl.u32 %v3443_v30, 16 }
  0x99   : > { %2593 = vmatmul.msk.bf16.gmra.mxu1 %vm491_vm4, %v2888_v44  ;;  %v1234_v44 = vsel %vm3127_vm5, %v1229_v29, %v1233_v34  ;;  %v1257_v34 = vrot.slane %v1255_v3, 5  ;;  %v3510_v3 = vld [vmem:[%s3090_s11 + $0x28] sm:$0xf] }
  0x9a   : > { %v1274_v18 = vunpack.c.l.b16 %v1234_v44  ;;  %v1247_v57 = vrot.slane %v1245_v45, 5  ;;  %v1251_v20 = vrot.slane %v1249_v47, 4  ;;  %v1764_v44 = vrot.slane %v1762_v4, 4 }
  0x9b   : > { %v1773_v45 = vrot.slane %v1771_v25, 5  ;;  %v1777_v47 = vrot.slane %v1775_v55, 4  ;;  %v1795_v55 = vshll.u32 %v3510_v3, 16 }
  0x9c   : > { %v1252_v26 = vor.u32 %v1251_v20, %v1247_v57 }
  0x9d   : > { %v1778_v20 = vor.u32 %v1777_v47, %v1773_v45 }
  0x9e   : > { %2610 = vmatmul.msk.bf16.gmra.mxu2 %vm491_vm4, %v794_v51  ;;  %v1238_v51 = vrot.slane %v1236_v33, 4  ;;  %v1253_v29 = vrot.slane %v1252_v26, 4  ;;  %v2792_v26 = vld [vmem:[%s3090_s11 + $0x24] sm:$0xf] }
  0x9f   : > { %v1779_v15 = vrot.slane %v1778_v20, 4  ;;  %v1786_v4 = vshrl.u32 %v2792_v26, 16  ;;  %v1789_v24 = vshll.u32 %v2792_v26, 16 }
  0xa0   : > { %v1242_v62 = vor.u32 %v1241_v52, %v1238_v51  ;;  %v2791_v51 = vld [vmem:[%s3090_s11 + $0x20] sm:$0x1] }
  0xa1   : > { %v2108_v47 = vrot.slane %v2791_v51, 5 }
  0xa2   : > { %v1243_v17 = vrot.slane %v1242_v62, 4  ;;  %v1781_v62 = vshll.u32 %v2791_v51, 16 }
  0xa3   : > { %2669 = vmatmul.msk.bf16.gmra.mxu3 %vm491_vm4, %v2896_v63  ;;  %v3431_v14 = vpop.f32.mrf.mxu1  ;;  %v1283_v63 = vpack.c.b16 %v1274_v18, %v1273_v49 }
  0xa4   : > { %v1248_v37 = vsel %vm3127_vm5, %v1243_v17, %v1247_v57  ;;  %v1768_v57 = vor.u32 %v1767_v41, %v1764_v44  ;;  %v1783_v11 = vrot.slane %v1781_v62, 5  ;;  %v2706_v44 = vld [vmem:[%s3090_s11 + $0x18] sm:$0xe] }
  0xa5   : > { %v1275_v52 = vunpack.c.l.b16 %v1248_v37 }
  0xa7   : > { %2702 = vmatmul.msk.bf16.gmra.mxu0 %vm491_vm4, %v1282_v13 }
  0xa9   : > { %2594 = vmatmul.msk.bf16.gmra.mxu1 %vm491_vm4, %v2889_v23  ;;  %v2705_v23 = vld [vmem:[%s3090_s11 + $0xc] sm:$0xe] }
  0xaa   : > { %v2713_v59 = vrot.slane %v2705_v23, 9  ;;  %v2105_v23 = vrot.slane %v3475_v35, 5 }
  0xab   : > { %v3450_v39 = vpop.f32.mrf.mxu1 }
  0xac   : > { %v1412_v18 = vsel %vm3237_vm8, %v2713_v59, %v1411_v46  ;;  %v2822_v46 = vld [vmem:[%s3090_s11 + $0x18] sm:$0xe]  ;;  %v1784_v59 = vsel %vm3127_vm5, %v1779_v15, %v1783_v11  ;;  %v2107_v41 = vrot.slane %v2105_v23, 4 }
  0xad   : > { %v3455_v48 = vpop.f32.mrf.mxu2  ;;  %v1467_v0 = vunpack.c.l.b16 %v1412_v18  ;;  %v1956_v62 = vunpack.c.l.b16 %v1784_v59 }
  0xae   : > { %2611 = vmatmul.msk.bf16.gmra.mxu2 %vm491_vm4, %v795_v31  ;;  %v1414_v31 = vrot.slane %v3248_v2, 5  ;;  %v1258_v2 = vsel %vm3127_vm5, %v1253_v29, %v1257_v34  ;;  %v1799_v29 = vshrl.u32 %v3510_v3, 16 }
  0xaf   : > { %v1276_v56 = vunpack.c.l.b16 %v1258_v2  ;;  %v1788_v2 = vrot.slane %v1786_v4, 4 }
  0xb0   : > { %v1415_v9 = vsel %vm3237_vm8, %v1413_v38, %v1414_v31  ;;  %v2830_v38 = vrot.slane %v2822_v46, 9 }
  0xb1   : > { %v3460_v58 = vpop.f32.mrf.mxu0  ;;  %v3465_v61 = vpop.f32.mrf.mxu3  ;;  %v1468_v1 = vunpack.c.l.b16 %v1415_v9  ;;  %v1284_v5 = vpack.c.b16 %v1276_v56, %v1275_v52  ;;  %v1791_v52 = vrot.slane %v1789_v24, 5  ;;  %v1801_v9 = vrot.slane %v1799_v29, 4 }
  0xb2   : > { %v2106_v51 = vsel %vm3237_vm8, %v2830_v38, %v2105_v23 }
  0xb3   : > { %2670 = vmatmul.msk.bf16.gmra.mxu3 %vm491_vm4, %v2897_v43  ;;  %v1483_v25 = vpack.c.b16 %v1468_v1, %v1467_v0  ;;  %v2109_v1 = vsel %vm3237_vm8, %v2107_v41, %v2108_v47  ;;  %v1792_v26 = vor.u32 %v1791_v52, %v1788_v2  ;;  %v2161_v4 = vunpack.c.l.b16 %v2106_v51  ;;  %v2823_v41 = vld [vmem:[%s3090_s11 + $0x24] sm:$0xe] }
  0xb4   : > { %v2162_v24 = vunpack.c.l.b16 %v2109_v1  ;;  %v2112_v47 = vrot.slane %v3510_v3, 5  ;;  %v1425_v51 = vrot.slane %v3312_v7, 5 }
  0xb5   : > { %v3482_v22 = vpop.f32.mrf.mxu2 }
  0xb6   : > { %v3478_v13 = vpop.f32.mrf.mxu1  ;;  %v2177_v2 = vpack.c.b16 %v2162_v24, %v2161_v4  ;;  %v2114_v3 = vrot.slane %v2112_v47, 4 }
  0xb7   : > { %2703 = vmatmul.msk.bf16.gmra.mxu0 %vm491_vm4, %v1283_v63 }
  0xb9   : > { %2595 = vmatmul.msk.bf16.gmra.mxu1 %vm491_vm4, %v2890_v6  ;;  %v3489_v33 = vpop.f32.mrf.mxu0  ;;  %v3493_v49 = vpop.f32.mrf.mxu3  ;;  %v1769_v6 = vrot.slane %v1768_v57, 4  ;;  %v3535_v57 = vld [vmem:[%s3090_s11 + $0x2c] sm:$0x1] }
  0xbb   : > { %v1774_v35 = vsel %vm3127_vm5, %v1769_v6, %v1773_v45  ;;  %v1421_v45 = vrot.slane %v3298_v53, 5  ;;  %v1805_v6 = vshll.u32 %v3535_v57, 16 }
  0xbc   : > { %v1955_v20 = vunpack.c.l.b16 %v1774_v35 }
  0xbd   : > { %v1807_v38 = vrot.slane %v1805_v6, 5 }
  0xbe   : > { %2612 = vmatmul.msk.bf16.gmra.mxu2 %vm491_vm4, %v796_v40  ;;  %v3499_v43 = vpop.f32.mrf.mxu1  ;;  %v1418_v40 = vrot.slane %v3279_v16, 5  ;;  %v1797_v16 = vrot.slane %v1795_v55, 5  ;;  %v1971_v23 = vpack.c.b16 %v1956_v62, %v1955_v20  ;;  %v1793_v55 = vrot.slane %v1792_v26, 4 }
  0xbf   : > { %v2115_v62 = vrot.slane %v3535_v57, 5 }
  0xc0   : > { %v1420_v56 = vrot.slane %v1418_v40, 4 }
  0xc1   : > { %v3506_v63 = vpop.f32.mrf.mxu2 }
  0xc2   : > { %v1422_v46 = vsel %vm3237_vm8, %v1420_v56, %v1421_v45  ;;  %v2831_v56 = vrot.slane %v2823_v41, 9  ;;  %v3580_v41 = vld [vmem:[%s3090_s11 + $0x38] sm:$0x1] }
  0xc3   : > { %2671 = vmatmul.msk.bf16.gmra.mxu3 %vm491_vm4, %v2898_v10  ;;  %v2714_v10 = vrot.slane %v2706_v44, 9  ;;  %v1470_v35 = vunpack.c.l.b16 %v1422_v46 }
  0xc4   : > { %v3513_v17 = vpop.f32.mrf.mxu0  ;;  %v2113_v57 = vsel %vm3237_vm8, %v2831_v56, %v2112_v47 }
  0xc5   : > { %v1419_v11 = vsel %vm3237_vm8, %v2714_v10, %v1418_v40  ;;  %v2795_v40 = vld [vmem:[%s3090_s11 + $0x30] sm:$0xf] }
  0xc6   : > { %v3519_v34 = vpop.f32.mrf.mxu3  ;;  %v648_v31 = vpop.f32.mrf.mxu1  ;;  %v1813_v1 = vshll.u32 %v2795_v40, 16 }
  0xc7   : > { %2704 = vmatmul.msk.bf16.gmra.mxu0 %vm491_vm4, %v1284_v5  ;;  %v649_v37 = vadd.f32 %v648_v31, %v3460_v58  ;;  %v2899_v58 = vld [vmem:[%s3090_s11 + $0x18] sm:$0xff]  ;;  %v1802_v5 = vor.u32 %v1801_v9, %v1797_v16  ;;  %v1469_v31 = vunpack.c.l.b16 %v1419_v11  ;;  %v1798_v9 = vsel %vm3127_vm5, %v1793_v55, %v1797_v16  ;;  %v2900_v55 = vld [vmem:[%s3090_s11 + $0x24] sm:$0xff] }
  0xc8   : > { %v1428_v11 = vrot.slane %v3331_v42, 5  ;;  %v1957_v46 = vunpack.c.l.b16 %v1798_v9  ;;  %v2116_v42 = vsel %vm3237_vm8, %v2114_v3, %v2115_v62 }
  0xc9   : > { %v3529_v18 = vpop.f32.mrf.mxu2  ;;  %2722 = vmatmul.msk.bf16.vlgmr.msra.gmra.mxu1 %vm491_vm4, %v1483_v25  ;;  %v1803_v59 = vrot.slane %v1802_v5, 4  ;;  %v2707_v5 = vld [vmem:[%s3090_s11 + $0x24] sm:$0xe] }
  0xcb   : > { %v1808_v10 = vsel %vm3127_vm5, %v1803_v59, %v1807_v38 }
  0xcc   : > { %v3537_v0 = vpop.f32.mrf.mxu0  ;;  %v1958_v7 = vunpack.c.l.b16 %v1808_v10 }
  0xce   : > { %v3544_v15 = vpop.f32.mrf.mxu3  ;;  %2781 = vmatmul.msk.bf16.vlgmr.msra.gmra.mxu2 %vm491_vm4, %v2899_v58  ;;  %v650_v53 = vpop.f32.mrf.mxu1  ;;  %v1484_v58 = vpack.c.b16 %v1470_v35, %v1469_v31  ;;  %v1427_v31 = vrot.slane %v1425_v51, 4  ;;  %v1815_v35 = vrot.slane %v1813_v1, 5 }
  0xcf   : > { %v651_v25 = vadd.f32 %v650_v53, %v3489_v33  ;;  %v3559_v33 = vld [vmem:[%s3090_s11 + $0x34] sm:$0xf] }
  0xd0   : > { %v1819_v6 = vshll.u32 %v3559_v33, 16  ;;  %v1823_v53 = vshrl.u32 %v3559_v33, 16 }
  0xd1   : > { %v833_v29 = vpop.f32.mrf.mxu2 }
  0xd2   : > { %v873_v44 = vadd.f32 %v833_v29, %v649_v37  ;;  %v1810_v37 = vshrl.u32 %v2795_v40, 16  ;;  %v2715_v29 = vrot.slane %v2707_v5, 9  ;;  %v1821_v59 = vrot.slane %v1819_v6, 5 }
  0xd3   : > { %2814 = vmatmul.msk.bf16.vlgmr.msra.gmra.mxu3 %vm491_vm4, %v1971_v23  ;;  %v1825_v38 = vrot.slane %v1823_v53, 4  ;;  %v1972_v40 = vpack.c.b16 %v1958_v7, %v1957_v46  ;;  %v3591_v53 = vld [vmem:[%s3090_s11 + $0x40] sm:$0xf]  ;;  %v2824_v7 = vld [vmem:[%s3090_s11 + $0x30] sm:$0xe] }
  0xd4   : > { %v1321_v52 = vpop.f32.mrf.mxu0  ;;  %v1812_v4 = vrot.slane %v1810_v37, 4  ;;  %v1426_v9 = vsel %vm3237_vm8, %v2715_v29, %v1425_v51  ;;  %v1847_v29 = vshrl.u32 %v3591_v53, 16 }
  0xd5   : > { %v1471_v62 = vunpack.c.l.b16 %v1426_v9 }
  0xd6   : > { %v987_v45 = vpop.f32.mrf.mxu3  ;;  %v653_v20 = vpop.f32.mrf.mxu1  ;;  %v1816_v10 = vor.u32 %v1815_v35, %v1812_v4 }
  0xd7   : > { %2839 = vmatmul.msk.bf16.vlgmr.msra.gmra.mxu0 %vm491_vm4, %v2177_v2  ;;  %v1027_v16 = vadd.f32 %v987_v45, %v873_v44  ;;  %v654_v26 = vadd.f32 %v653_v20, %v3513_v17  ;;  %v2163_v2 = vunpack.c.l.b16 %v2113_v57  ;;  %v1826_v45 = vor.u32 %v1825_v38, %v1821_v59 }
  0xd8   : > { %v1829_v20 = vshll.u32 %v3580_v41, 16  ;;  %v1817_v6 = vrot.slane %v1816_v10, 4  ;;  %v2119_v57 = vrot.slane %v3559_v33, 5  ;;  %v1432_v38 = vrot.slane %v3340_v54, 5 }
  0xd9   : > { %v835_v23 = vpop.f32.mrf.mxu2  ;;  %2723 = vmatmul.msk.bf16.gmra.mxu1 %vm491_vm4, %v1484_v58  ;;  %v3574_v24 = vadd.f32 %v1321_v52, %v1027_v16  ;;  %v1429_v58 = vsel %vm3237_vm8, %v1427_v31, %v1428_v11  ;;  %v2798_v16 = vld [vmem:[%s3090_s11 + $0x3c] sm:$0xf]  ;;  %v1827_v11 = vrot.slane %v1826_v45, 4  ;;  %v1849_v10 = vrot.slane %v1847_v29, 4 }
  0xda   : > { %v874_v17 = vadd.f32 %v835_v23, %v651_v25  ;;  %v2164_v25 = vunpack.c.l.b16 %v2116_v42  ;;  %v1472_v1 = vunpack.c.l.b16 %v1429_v58  ;;  %v1831_v46 = vrot.slane %v1829_v20, 5  ;;  %v2901_v20 = vld [vmem:[%s3090_s11 + $0x30] sm:$0xff] }
  0xdb   : > { %v1834_v4 = vshrl.u32 %v2798_v16, 16  ;;  %v1822_v42 = vsel %vm3127_vm5, %v1817_v6, %v1821_v59 }
  0xdc   : > { %v1323_v44 = vpop.f32.mrf.mxu0  ;;  %v2178_v51 = vpack.c.b16 %v2164_v25, %v2163_v2  ;;  %v2832_v2 = vrot.slane %v2824_v7, 9  ;;  %v2121_v25 = vrot.slane %v2119_v57, 4 }
  0xdd   : > { %v1836_v9 = vrot.slane %v1834_v4, 4 }
  0xde   : > { %v989_v47 = vpop.f32.mrf.mxu3  ;;  %2782 = vmatmul.msk.bf16.gmra.mxu2 %vm491_vm4, %v2900_v55  ;;  %v655_v52 = vpop.f32.mrf.mxu1  ;;  %v1485_v55 = vpack.c.b16 %v1472_v1, %v1471_v62  ;;  %v1434_v62 = vrot.slane %v1432_v38, 4  ;;  %v3615_v1 = vld [vmem:[%s3090_s11 + $0x44] sm:$0x1] }
  0xdf   : > { %v1028_v56 = vadd.f32 %v989_v47, %v874_v17  ;;  %v656_v37 = vadd.f32 %v655_v52, %v3537_v0  ;;  %v1837_v17 = vshll.u32 %v2798_v16, 16  ;;  %v2708_v47 = vld [vmem:[%s3090_s11 + $0x30] sm:$0xe]  ;;  %v2122_v52 = vrot.slane %v3580_v41, 5 }
  0xe0   : > { %v1959_v16 = vunpack.c.l.b16 %v1822_v42  ;;  %v2120_v41 = vsel %vm3237_vm8, %v2832_v2, %v2119_v57 }
  0xe1   : > { %v838_v3 = vpop.f32.mrf.mxu2  ;;  %v3594_v23 = vadd.f32 %v1323_v44, %v1028_v56  ;;  %v1839_v58 = vrot.slane %v1837_v17, 5 }
  0xe2   : > { %v875_v5 = vadd.f32 %v838_v3, %v654_v26  ;;  %v1843_v26 = vshll.u32 %v3591_v53, 16  ;;  %v2716_v3 = vrot.slane %v2708_v47, 9 }
  0xe3   : > { %2815 = vmatmul.msk.bf16.gmra.mxu3 %vm491_vm4, %v1972_v40  ;;  %v1832_v40 = vsel %vm3127_vm5, %v1827_v11, %v1831_v46  ;;  %v1840_v11 = vor.u32 %v1839_v58, %v1836_v9 }
  0xe4   : > { %v1326_v0 = vpop.f32.mrf.mxu0  ;;  %v1845_v54 = vrot.slane %v1843_v26, 5  ;;  %v1433_v4 = vsel %vm3237_vm8, %v2716_v3, %v1432_v38  ;;  %v2801_v38 = vld [vmem:[%s3090_s11 + $0x48] sm:$0xf] }
  0xe5   : > { %v1473_v42 = vunpack.c.l.b16 %v1433_v4 }
  0xe6   : > { %v992_v31 = vpop.f32.mrf.mxu3  ;;  %v658_v35 = vpop.f32.mrf.mxu1  ;;  %v1850_v46 = vor.u32 %v1849_v10, %v1845_v54  ;;  %v3637_v10 = vld [vmem:[%s3090_s11 + $0x4c] sm:$0xf] }
  0xe7   : > { %2840 = vmatmul.msk.bf16.gmra.mxu0 %vm491_vm4, %v2178_v51  ;;  %v1029_v44 = vadd.f32 %v992_v31, %v875_v5  ;;  %v659_v33 = vadd.f32 %v658_v35, %v3431_v14  ;;  %v1435_v14 = vrot.slane %v3351_v8, 5  ;;  %v1960_v5 = vunpack.c.l.b16 %v1832_v40 }
  0xe8   : > { %v2123_v51 = vsel %vm3237_vm8, %v2121_v25, %v2122_v52  ;;  %v1841_v31 = vrot.slane %v1840_v11, 4  ;;  %v1851_v40 = vrot.slane %v1850_v46, 4  ;;  %v2825_v25 = vld [vmem:[%s3090_s11 + $0x3c] sm:$0xe]  ;;  %v2126_v52 = vrot.slane %v3591_v53, 5 }
  0xe9   : > { %v840_v59 = vpop.f32.mrf.mxu2  ;;  %2724 = vmatmul.msk.bf16.gmra.mxu1 %vm491_vm4, %v1485_v55  ;;  %v3610_v56 = vadd.f32 %v1326_v0, %v1029_v44  ;;  %v1853_v0 = vshll.u32 %v3615_v1, 16  ;;  %v1436_v57 = vsel %vm3237_vm8, %v1434_v62, %v1435_v14  ;;  %v1973_v55 = vpack.c.b16 %v1960_v5, %v1959_v16 }
  0xea   : > { %v876_v45 = vadd.f32 %v840_v59, %v656_v37  ;;  %v2165_v37 = vunpack.c.l.b16 %v2120_v41  ;;  %v2166_v26 = vunpack.c.l.b16 %v2123_v51  ;;  %v1474_v44 = vunpack.c.l.b16 %v1436_v57  ;;  %v2709_v51 = vld [vmem:[%s3090_s11 + $0x3c] sm:$0xe] }
  0xeb   : > { %v1855_v2 = vrot.slane %v1853_v0, 5  ;;  %v2128_v62 = vrot.slane %v2126_v52, 4  ;;  %v2129_v16 = vrot.slane %v3615_v1, 5  ;;  %v1439_v5 = vrot.slane %v3359_v21, 5  ;;  %v2902_v57 = vld [vmem:[%s3090_s11 + $0x3c] sm:$0xff] }
  0xec   : > { %v1328_v6 = vpop.f32.mrf.mxu0  ;;  %v2179_v9 = vpack.c.b16 %v2166_v26, %v2165_v37  ;;  %v1486_v14 = vpack.c.b16 %v1474_v44, %v1473_v42  ;;  %v1861_v41 = vshll.u32 %v2801_v38, 16  ;;  %v1867_v11 = vshll.u32 %v3637_v10, 16  ;;  %v2803_v44 = vld [vmem:[%s3090_s11 + $0x50] sm:$0x1] }
  0xed   : > { %v1871_v46 = vshrl.u32 %v3637_v10, 16  ;;  %v1442_v0 = vrot.slane %v3374_v50, 5  ;;  %v2130_v50 = vsel %vm3237_vm8, %v2128_v62, %v2129_v16 }
  0xee   : > { %v994_v8 = vpop.f32.mrf.mxu3  ;;  %2783 = vmatmul.msk.bf16.gmra.mxu2 %vm491_vm4, %v2901_v20  ;;  %v660_v7 = vpop.f32.mrf.mxu1  ;;  %v1858_v20 = vshrl.u32 %v2801_v38, 16  ;;  %v1863_v26 = vrot.slane %v1861_v41, 5 }
  0xef   : > { %v1030_v17 = vadd.f32 %v994_v8, %v876_v45  ;;  %v661_v29 = vadd.f32 %v660_v7, %v3450_v39  ;;  %v1846_v39 = vsel %vm3127_vm5, %v1841_v31, %v1845_v54  ;;  %v2833_v45 = vrot.slane %v2825_v25, 9 }
  0xf0   : > { %v1961_v8 = vunpack.c.l.b16 %v1846_v39  ;;  %v1860_v7 = vrot.slane %v1858_v20, 4  ;;  %v1869_v31 = vrot.slane %v1867_v11, 5  ;;  %v2168_v25 = vunpack.c.l.b16 %v2130_v50 }
  0xf1   : > { %v843_v35 = vpop.f32.mrf.mxu2  ;;  %v3632_v58 = vadd.f32 %v1328_v6, %v1030_v17  ;;  %v2127_v1 = vsel %vm3237_vm8, %v2833_v45, %v2126_v52  ;;  %v2717_v17 = vrot.slane %v2709_v51, 9  ;;  %v2136_v50 = vrot.slane %v2803_v44, 5 }
  0xf2   : > { %v877_v47 = vadd.f32 %v843_v35, %v659_v33  ;;  %v1856_v33 = vsel %vm3127_vm5, %v1851_v40, %v1855_v2  ;;  %v1873_v35 = vrot.slane %v1871_v46, 4  ;;  %v2167_v2 = vunpack.c.l.b16 %v2127_v1  ;;  %v2804_v46 = vld [vmem:[%s3090_s11 + $0x54] sm:$0xf] }
  0xf3   : > { %2816 = vmatmul.msk.bf16.gmra.mxu3 %vm491_vm4, %v1973_v55  ;;  %v1962_v21 = vunpack.c.l.b16 %v1856_v33  ;;  %v1441_v55 = vrot.slane %v1439_v5, 4  ;;  %v1877_v33 = vshll.u32 %v2803_v44, 16 }
  0xf4   : > { %v1331_v59 = vpop.f32.mrf.mxu0  ;;  %v2180_v16 = vpack.c.b16 %v2168_v25, %v2167_v2 }
  0xf5   : > { %v1974_v40 = vpack.c.b16 %v1962_v21, %v1961_v8  ;;  %v1443_v38 = vsel %vm3237_vm8, %v1441_v55, %v1442_v0  ;;  %v1879_v41 = vrot.slane %v1877_v33, 5  ;;  %v3671_v8 = vld [vmem:[%s3090_s11 + $0x58] sm:$0xf]  ;;  %v1885_v55 = vshll.u32 %v2804_v46, 16 }
  0xf6   : > { %v997_v53 = vpop.f32.mrf.mxu3  ;;  %v663_v3 = vpop.f32.mrf.mxu1 }
  0xf7   : > { %2841 = vmatmul.msk.bf16.gmra.mxu0 %vm491_vm4, %v2179_v9  ;;  %v1031_v54 = vadd.f32 %v997_v53, %v877_v47  ;;  %v664_v6 = vadd.f32 %v663_v3, %v3478_v13  ;;  %v1864_v9 = vor.u32 %v1863_v26, %v1860_v7  ;;  %v1476_v53 = vunpack.c.l.b16 %v1443_v38 }
  0xf8   : > { %v1446_v7 = vrot.slane %v3386_v28, 5 }
  0xf9   : > { %v845_v37 = vpop.f32.mrf.mxu2  ;;  %2725 = vmatmul.msk.bf16.gmra.mxu1 %vm491_vm4, %v1486_v14  ;;  %v3652_v4 = vadd.f32 %v1331_v59, %v1031_v54  ;;  %v1874_v14 = vor.u32 %v1873_v35, %v1869_v31  ;;  %v1865_v62 = vrot.slane %v1864_v9, 4  ;;  %v2826_v54 = vld [vmem:[%s3090_s11 + $0x48] sm:$0xe]  ;;  %v1891_v35 = vshll.u32 %v3671_v8, 16 }
  0xfa   : > { %v878_v13 = vadd.f32 %v845_v37, %v661_v29  ;;  %v1440_v29 = vsel %vm3237_vm8, %v2717_v17, %v1439_v5  ;;  %v2834_v1 = vrot.slane %v2826_v54, 9  ;;  %v1882_v17 = vshrl.u32 %v2804_v46, 16 }
  0xfb   : > { %v1475_v20 = vunpack.c.l.b16 %v1440_v29  ;;  %v1875_v5 = vrot.slane %v1874_v14, 4  ;;  %v1448_v29 = vrot.slane %v1446_v7, 4  ;;  %v1893_v33 = vrot.slane %v1891_v35, 5 }
  0xfc   : > { %v1333_v42 = vpop.f32.mrf.mxu0  ;;  %v1884_v9 = vrot.slane %v1882_v17, 4  ;;  %v2140_v35 = vrot.slane %v3671_v8, 5 }
  0xfd   : > { %v1487_v0 = vpack.c.b16 %v1476_v53, %v1475_v20  ;;  %v3692_v20 = vld [vmem:[%s3090_s11 + $0x5c] sm:$0x1] }
  0xfe   : > { %v999_v47 = vpop.f32.mrf.mxu3  ;;  %2784 = vmatmul.msk.bf16.gmra.mxu2 %vm491_vm4, %v2902_v57  ;;  %v665_v52 = vpop.f32.mrf.mxu1  ;;  %v1880_v57 = vsel %vm3127_vm5, %v1875_v5, %v1879_v41 }
  0xff   : > { %v1032_v59 = vadd.f32 %v999_v47, %v878_v13  ;;  %v666_v39 = vadd.f32 %v665_v52, %v3499_v43  ;;  %v2133_v43 = vrot.slane %v3637_v10, 5  ;;  %v2710_v10 = vld [vmem:[%s3090_s11 + $0x48] sm:$0xe]  ;;  %v1964_v38 = vunpack.c.l.b16 %v1880_v57  ;;  %v2807_v57 = vld [vmem:[%s3090_s11 + $0x60] sm:$0xf] }
 0x100   : > { %v2903_v47 = vld [vmem:[%s3090_s11 + $0x48] sm:$0xff]  ;;  %v2718_v52 = vrot.slane %v2710_v10, 9  ;;  %v3703_v10 = vld [vmem:[%s3090_s11 + $0x64] sm:$0xf] }
 0x101   : > { %v848_v45 = vpop.f32.mrf.mxu2  ;;  %v3666_v51 = vadd.f32 %v1333_v42, %v1032_v59  ;;  %v2135_v26 = vrot.slane %v2133_v43, 4  ;;  %v1895_v42 = vshrl.u32 %v3671_v8, 16  ;;  %v2134_v44 = vsel %vm3237_vm8, %v2834_v1, %v2133_v43 }
 0x102   : > { %v879_v3 = vadd.f32 %v848_v45, %v664_v6  ;;  %v1870_v6 = vsel %vm3127_vm5, %v1865_v62, %v1869_v31  ;;  %v1449_v31 = vrot.slane %v3401_v27, 5  ;;  %v1887_v59 = vrot.slane %v1885_v55, 5 }
 0x103   : > { %2817 = vmatmul.msk.bf16.gmra.mxu3 %vm491_vm4, %v1974_v40  ;;  %v1963_v25 = vunpack.c.l.b16 %v1870_v6  ;;  %v2137_v27 = vsel %vm3237_vm8, %v2135_v26, %v2136_v50  ;;  %v1897_v45 = vrot.slane %v1895_v42, 4  ;;  %v1447_v62 = vsel %vm3237_vm8, %v2718_v52, %v1446_v7 }
 0x104   : > { %v1336_v11 = vpop.f32.mrf.mxu0  ;;  %v2170_v54 = vunpack.c.l.b16 %v2137_v27  ;;  %v1477_v6 = vunpack.c.l.b16 %v1447_v62  ;;  %v1453_v52 = vrot.slane %v3414_v19, 5  ;;  %v2142_v19 = vrot.slane %v2140_v35, 4 }
 0x105   : > { %v1975_v41 = vpack.c.b16 %v1964_v38, %v1963_v25  ;;  %v1898_v46 = vor.u32 %v1897_v45, %v1893_v33  ;;  %v1456_v38 = vrot.slane %v3428_v12, 5  ;;  %v2143_v45 = vrot.slane %v3692_v20, 5 }
 0x106   : > { %v1002_v37 = vpop.f32.mrf.mxu3  ;;  %v668_v21 = vpop.f32.mrf.mxu1 }
 0x107   : > { %2842 = vmatmul.msk.bf16.gmra.mxu0 %vm491_vm4, %v2180_v16  ;;  %v1033_v13 = vadd.f32 %v1002_v37, %v879_v3  ;;  %v1450_v16 = vsel %vm3237_vm8, %v1448_v29, %v1449_v31  ;;  %v669_v43 = vadd.f32 %v668_v21, %v3455_v48  ;;  %v1899_v50 = vrot.slane %v1898_v46, 4  ;;  %v2827_v21 = vld [vmem:[%s3090_s11 + $0x54] sm:$0xe] }
 0x108   : > { %v1478_v1 = vunpack.c.l.b16 %v1450_v16  ;;  %v1906_v31 = vshrl.u32 %v2807_v57, 16  ;;  %v1919_v29 = vshrl.u32 %v3703_v10, 16 }
 0x109   : > { %v850_v40 = vpop.f32.mrf.mxu2  ;;  %2726 = vmatmul.msk.bf16.gmra.mxu1 %vm491_vm4, %v1487_v0  ;;  %v3684_v28 = vadd.f32 %v1336_v11, %v1033_v13  ;;  %v1888_v11 = vor.u32 %v1887_v59, %v1884_v9  ;;  %v1901_v0 = vshll.u32 %v3692_v20, 16  ;;  %v2835_v9 = vrot.slane %v2827_v21, 9  ;;  %v2711_v59 = vld [vmem:[%s3090_s11 + $0x54] sm:$0xe] }
 0x10a   : > { %v880_v2 = vadd.f32 %v850_v40, %v666_v39  ;;  %v2169_v39 = vunpack.c.l.b16 %v2134_v44  ;;  %v1488_v42 = vpack.c.b16 %v1478_v1, %v1477_v6  ;;  %v1909_v40 = vshll.u32 %v2807_v57, 16 }
 0x10b   : > { %v1889_v17 = vrot.slane %v1888_v11, 4  ;;  %v1903_v48 = vrot.slane %v1901_v0, 5  ;;  %v1908_v12 = vrot.slane %v1906_v31, 4  ;;  %v2141_v20 = vsel %vm3237_vm8, %v2835_v9, %v2140_v35 }
 0x10c   : > { %v1338_v14 = vpop.f32.mrf.mxu0  ;;  %v2181_v7 = vpack.c.b16 %v2170_v54, %v2169_v39  ;;  %v1911_v39 = vrot.slane %v1909_v40, 5  ;;  %v2144_v0 = vsel %vm3237_vm8, %v2142_v19, %v2143_v45 }
 0x10d   : > { %v1894_v8 = vsel %vm3127_vm5, %v1889_v17, %v1893_v33  ;;  %v1904_v27 = vsel %vm3127_vm5, %v1899_v50, %v1903_v48  ;;  %v2171_v48 = vunpack.c.l.b16 %v2141_v20  ;;  %v2172_v21 = vunpack.c.l.b16 %v2144_v0 }
 0x10e   : > { %v1004_v53 = vpop.f32.mrf.mxu3  ;;  %2785 = vmatmul.msk.bf16.gmra.mxu2 %vm491_vm4, %v2903_v47  ;;  %v670_v3 = vpop.f32.mrf.mxu1  ;;  %v1965_v54 = vunpack.c.l.b16 %v1894_v8  ;;  %v1966_v11 = vunpack.c.l.b16 %v1904_v27  ;;  %v2147_v8 = vrot.slane %v3703_v10, 5 }
 0x10f   : > { %v1034_v5 = vadd.f32 %v1004_v53, %v880_v2  ;;  %v1915_v2 = vshll.u32 %v3703_v10, 16 }
 0x110   : > { %v1976_v50 = vpack.c.b16 %v1966_v11, %v1965_v54 }
 0x111   : > { %v853_v37 = vpop.f32.mrf.mxu2  ;;  %v3706_v55 = vadd.f32 %v1338_v14, %v1034_v5  ;;  %v671_v14 = vadd.f32 %v670_v3, %v3482_v22  ;;  %v3723_v62 = vrot.slane %v1915_v2, 5  ;;  %v2904_v5 = vld [vmem:[%s3090_s11 + $0x54] sm:$0xff]  ;;  %v1455_v22 = vrot.slane %v1453_v52, 4 }
 0x112   : > { %v881_v13 = vadd.f32 %v853_v37, %v669_v43  ;;  %v1921_v3 = vrot.slane %v1919_v29, 4  ;;  %v3729_v43 = vld [vmem:[%s3090_s11 + $0x68] sm:$0x1]  ;;  %v1912_v37 = vor.u32 %v1911_v39, %v1908_v12  ;;  %v1460_v39 = vrot.slane %v3443_v30, 5 }
 0x113   : > { %2818 = vmatmul.msk.bf16.gmra.mxu3 %vm491_vm4, %v1975_v41  ;;  %v2719_v41 = vrot.slane %v2711_v59, 9  ;;  %v1457_v57 = vsel %vm3237_vm8, %v1455_v22, %v1456_v38  ;;  %v1925_v17 = vshll.u32 %v3729_v43, 16  ;;  %v2182_v38 = vpack.c.b16 %v2172_v21, %v2171_v48  ;;  %v2812_v48 = vld [vmem:[%s3090_s11 + $0x74] sm:$0x1] }
 0x114   : > { %v1341_v26 = vpop.f32.mrf.mxu0  ;;  %v1480_v40 = vunpack.c.l.b16 %v1457_v57  ;;  %v2150_v54 = vrot.slane %v3729_v43, 5  ;;  %v1462_v57 = vrot.slane %v1460_v39, 4 }
 0x115   : > { %v1927_v29 = vrot.slane %v1925_v17, 5 }
 0x116   : > { %v1007_v47 = vpop.f32.mrf.mxu3  ;;  %v673_v25 = vpop.f32.mrf.mxu1 }
 0x117   : > { %2843 = vmatmul.msk.bf16.gmra.mxu0 %vm491_vm4, %v2181_v7  ;;  %v1035_v44 = vadd.f32 %v1007_v47, %v881_v13  ;;  %v1454_v13 = vsel %vm3237_vm8, %v2719_v41, %v1453_v52  ;;  %v1922_v7 = vor.u32 %v1921_v3, %v3723_v62  ;;  %v674_v35 = vadd.f32 %v673_v25, %v3506_v63  ;;  %v3750_v25 = vld [vmem:[%s3090_s11 + $0x70] sm:$0xf] }
 0x118   : > { %v1479_v31 = vunpack.c.l.b16 %v1454_v13  ;;  %v1913_v47 = vrot.slane %v1912_v37, 4  ;;  %v1943_v11 = vshrl.u32 %v3750_v25, 16  ;;  %v2905_v37 = vld [vmem:[%s3090_s11 + $0x60] sm:$0xff] }
 0x119   : > { %v855_v53 = vpop.f32.mrf.mxu2  ;;  %2727 = vmatmul.msk.bf16.gmra.mxu1 %vm491_vm4, %v1488_v42  ;;  %v3725_v16 = vadd.f32 %v1341_v26, %v1035_v44  ;;  %v1923_v52 = vrot.slane %v1922_v7, 4  ;;  %v2828_v44 = vld [vmem:[%s3090_s11 + $0x60] sm:$0xe] }
 0x11a   : > { %v882_v33 = vadd.f32 %v855_v53, %v671_v14  ;;  %v2810_v14 = vld [vmem:[%s3090_s11 + $0x6c] sm:$0xf]  ;;  %v1489_v63 = vpack.c.b16 %v1480_v40, %v1479_v31  ;;  %v1918_v45 = vsel %vm3127_vm5, %v1913_v47, %v3723_v62  ;;  %v2836_v12 = vrot.slane %v2828_v44, 9 }
 0x11b   : > { %v1928_v53 = vsel %vm3127_vm5, %v1923_v52, %v1927_v29  ;;  %v1930_v41 = vshrl.u32 %v2810_v14, 16  ;;  %v1933_v22 = vshll.u32 %v2810_v14, 16  ;;  %v1939_v62 = vshll.u32 %v3750_v25, 16 }
 0x11c   : > { %v1343_v46 = vpop.f32.mrf.mxu0  ;;  %v2148_v43 = vsel %vm3237_vm8, %v2836_v12, %v2147_v8 }
 0x11d   : > { %v1935_v7 = vrot.slane %v1933_v22, 5 }
 0x11e   : > { %v1009_v6 = vpop.f32.mrf.mxu3  ;;  %2786 = vmatmul.msk.bf16.gmra.mxu2 %vm491_vm4, %v2904_v5  ;;  %v675_v1 = vpop.f32.mrf.mxu1  ;;  %v2712_v5 = vld [vmem:[%s3090_s11 + $0x60] sm:$0xe] }
 0x11f   : > { %v1036_v26 = vadd.f32 %v1009_v6, %v882_v33  ;;  %v2149_v33 = vrot.slane %v2147_v8, 4  ;;  %v676_v3 = vadd.f32 %v675_v1, %v3529_v18  ;;  %v1967_v6 = vunpack.c.l.b16 %v1918_v45 }
 0x120   : > { %v2720_v13 = vrot.slane %v2712_v5, 9  ;;  %v1968_v18 = vunpack.c.l.b16 %v1928_v53  ;;  %v1932_v1 = vrot.slane %v1930_v41, 4  ;;  %v1949_v8 = vshll.u32 %v2812_v48, 16  ;;  %v2829_v5 = vld [vmem:[%s3090_s11 + $0x6c] sm:$0xe] }
 0x121   : > { %v858_v42 = vpop.f32.mrf.mxu2  ;;  %v3746_v9 = vadd.f32 %v1343_v46, %v1036_v26  ;;  %v1463_v46 = vrot.slane %v3463_v60, 5  ;;  %v2151_v60 = vsel %vm3237_vm8, %v2149_v33, %v2150_v54  ;;  %v1941_v26 = vrot.slane %v1939_v62, 5 }
 0x122   : > { %v883_v2 = vadd.f32 %v858_v42, %v674_v35  ;;  %v2173_v35 = vunpack.c.l.b16 %v2148_v43  ;;  %v1461_v31 = vsel %vm3237_vm8, %v2720_v13, %v1460_v39  ;;  %v1977_v47 = vpack.c.b16 %v1968_v18, %v1967_v6  ;;  %v2906_v13 = vld [vmem:[%s3090_s11 + $0x6c] sm:$0xff] }
 0x123   : > { %2819 = vmatmul.msk.bf16.gmra.mxu3 %vm491_vm4, %v1976_v50  ;;  %v1945_v50 = vrot.slane %v1943_v11, 4  ;;  %v1464_v40 = vsel %vm3237_vm8, %v1462_v57, %v1463_v46  ;;  %v2174_v52 = vunpack.c.l.b16 %v2151_v60  ;;  %v1936_v29 = vor.u32 %v1935_v7, %v1932_v1 }
 0x124   : > { %v1346_v59 = vpop.f32.mrf.mxu0  ;;  %v1481_v14 = vunpack.c.l.b16 %v1461_v31  ;;  %v1951_v33 = vrot.slane %v1949_v8, 5  ;;  %v2154_v41 = vrot.slane %v3750_v25, 5  ;;  %v2837_v62 = vrot.slane %v2829_v5, 9 }
 0x125   : > { %v1946_v44 = vor.u32 %v1945_v50, %v1941_v26  ;;  %v2183_v53 = vpack.c.b16 %v2174_v52, %v2173_v35  ;;  %v1937_v12 = vrot.slane %v1936_v29, 4 }
 0x126   : > { %v1012_v27 = vpop.f32.mrf.mxu3  ;;  %v678_v19 = vpop.f32.mrf.mxu1  ;;  %v2155_v1 = vsel %vm3237_vm8, %v2837_v62, %v2154_v41 }
 0x127   : > { %2844 = vmatmul.msk.bf16.gmra.mxu0 %vm491_vm4, %v2182_v38  ;;  %v1037_v10 = vadd.f32 %v1012_v27, %v883_v2  ;;  %v679_v38 = vadd.f32 %v678_v19, %v3465_v61  ;;  %v1942_v54 = vsel %vm3127_vm5, %v1937_v12, %v1941_v26  ;;  %v2175_v26 = vunpack.c.l.b16 %v2155_v1 }
 0x128   : > { %v1969_v57 = vunpack.c.l.b16 %v1942_v54 }
 0x129   : > { %v860_v20 = vpop.f32.mrf.mxu2  ;;  %2728 = vmatmul.msk.bf16.gmra.mxu1 %vm491_vm4, %v1489_v63  ;;  %v3766_v30 = vadd.f32 %v1346_v59, %v1037_v10  ;;  %v1482_v63 = vunpack.c.l.b16 %v1464_v40  ;;  %v1947_v10 = vrot.slane %v1946_v44, 4 }
 0x12a   : > { %v884_v0 = vadd.f32 %v860_v20, %v676_v3  ;;  %v2156_v20 = vrot.slane %v2154_v41, 4 }
 0x12b   : > { %v1490_v61 = vpack.c.b16 %v1482_v63, %v1481_v14  ;;  %v1952_v46 = vsel %vm3127_vm5, %v1947_v10, %v1951_v33 }
 0x12c   : > { %v1348_v17 = vpop.f32.mrf.mxu0  ;;  %v1970_v18 = vunpack.c.l.b16 %v1952_v46 }
 0x12e   : > { %v1014_v21 = vpop.f32.mrf.mxu3  ;;  %2787 = vmatmul.msk.bf16.gmra.mxu2 %vm491_vm4, %v2905_v37  ;;  %v680_v42 = vpop.f32.mrf.mxu1  ;;  %v1978_v60 = vpack.c.b16 %v1970_v18, %v1969_v57 }
 0x12f   : > { %v1038_v2 = vadd.f32 %v1014_v21, %v884_v0  ;;  %v681_v11 = vadd.f32 %v680_v42, %v3493_v49  ;;  %v2157_v0 = vrot.slane %v2812_v48, 5 }
 0x131   : > { %v863_v59 = vpop.f32.mrf.mxu2  ;;  %v3780_v27 = vadd.f32 %v1348_v17, %v1038_v2  ;;  %v2158_v49 = vsel %vm3237_vm8, %v2156_v20, %v2157_v0 }
 0x132   : > { %v885_v45 = vadd.f32 %v863_v59, %v679_v38  ;;  %v2176_v50 = vunpack.c.l.b16 %v2158_v49 }
 0x133   : > { %2820 = vmatmul.msk.bf16.gmra.mxu3 %vm491_vm4, %v1977_v47 }
 0x134   : > { %v1351_v39 = vpop.f32.mrf.mxu0  ;;  %v2184_v31 = vpack.c.b16 %v2176_v50, %v2175_v26 }
 0x136   : > { %v1017_v19 = vpop.f32.mrf.mxu3  ;;  %v683_v22 = vpop.f32.mrf.mxu1 }
 0x137   : > { %2845 = vmatmul.msk.bf16.gmra.mxu0 %vm491_vm4, %v2183_v53  ;;  %v1039_v3 = vadd.f32 %v1017_v19, %v885_v45  ;;  %v684_v48 = vadd.f32 %v683_v22, %v3519_v34 }
 0x139   : > { %v865_v37 = vpop.f32.mrf.mxu2  ;;  %2729 = vmatmul.msk.bf16.gmra.mxu1 %vm491_vm4, %v1490_v61  ;;  %v3792_v25 = vadd.f32 %v1351_v39, %v1039_v3  ;;  %v3816_v3 = vld [vmem:[%s3908_s2] ss:$0 sm:$0xff] }
 0x13a   : > { %v886_v6 = vadd.f32 %v865_v37, %v681_v11 }
 0x13c   : > { %v1353_v43 = vpop.f32.mrf.mxu0 }
 0x13e   : > { %v1019_v36 = vpop.f32.mrf.mxu3  ;;  %2788 = vmatmul.msk.bf16.gmra.mxu2 %vm491_vm4, %v2906_v13  ;;  %v685_v7 = vpop.f32.mrf.mxu1 }
 0x13f   : > { %v1040_v17 = vadd.f32 %v1019_v36, %v886_v6  ;;  %v686_v29 = vadd.f32 %v685_v7, %v3544_v15 }
 0x141   : > { %v868_v21 = vpop.f32.mrf.mxu2  ;;  %v3801_v35 = vadd.f32 %v1353_v43, %v1040_v17 }
 0x142   : > { %v887_v42 = vadd.f32 %v868_v21, %v684_v48 }
 0x143   : > { %2821 = vmatmul.msk.bf16.gmra.mxu3 %vm491_vm4, %v1978_v60 }
 0x144   : > { %v1356_v40 = vpop.f32.mrf.mxu0 }
 0x146   : > { %v1022_v32 = vpop.f32.mrf.mxu3  ;;  %v1527_v2 = vpop.f32.mrf.mxu1 }
 0x147   : > { %2846 = vmatmul.msk.bf16.gmra.mxu0 %vm491_vm4, %v2184_v31  ;;  %v1041_v47 = vadd.f32 %v1022_v32, %v887_v42  ;;  %v1567_v52 = vadd.f32 %v1527_v2, %v3574_v24 }
 0x149   : > { %v870_v38 = vpop.f32.mrf.mxu2  ;;  %v3807_v44 = vadd.f32 %v1356_v40, %v1041_v47 }
 0x14a   : > { %v888_v34 = vadd.f32 %v870_v38, %v686_v29 }
 0x14c   : > { %v1358_v8 = vpop.f32.mrf.mxu0 }
 0x14e   : > { %v1024_v59 = vpop.f32.mrf.mxu3  ;;  %v1529_v14 = vpop.f32.mrf.mxu1 }
 0x14f   : > { %v1042_v63 = vadd.f32 %v1024_v59, %v888_v34  ;;  %v1568_v45 = vadd.f32 %v1529_v14, %v3594_v23 }
 0x151   : > { %v1681_v53 = vpop.f32.mrf.mxu2  ;;  %v3810_v12 = vadd.f32 %v1358_v8, %v1042_v63 }
 0x152   : > { %v1721_v39 = vadd.f32 %v1681_v53, %v1567_v52 }
 0x154   : > { %v2221_v10 = vpop.f32.mrf.mxu0 }
 0x156   : > { %v2015_v33 = vpop.f32.mrf.mxu3  ;;  %v1532_v5 = vpop.f32.mrf.mxu1 }
 0x157   : > { %v2055_v24 = vadd.f32 %v2015_v33, %v1721_v39  ;;  %v1569_v15 = vadd.f32 %v1532_v5, %v3610_v56 }
 0x159   : > { %v2261_v41 = vadd.f32 %v2221_v10, %v2055_v24  ;;  %v1683_v61 = vpop.f32.mrf.mxu2 }
 0x15a   : > { %v1722_v19 = vadd.f32 %v1683_v61, %v1568_v45 }
 0x15b   : > { %v2281_v46 = vadd.f32 %v3816_v3, %v2261_v41 }
 0x15c   : > { %v2223_v22 = vpop.f32.mrf.mxu0 }
 0x15d   : > { %v2297_v13 = vmax.f32 %v2281_v46, 0.0 }
 0x15e   : > { %v2017_v23 = vpop.f32.mrf.mxu3  ;;  %v1534_v54 = vpop.f32.mrf.mxu1 }
 0x15f   : > { %v2056_v62 = vadd.f32 %v2017_v23, %v1722_v19  ;;  %v1570_v11 = vadd.f32 %v1534_v54, %v3632_v58 }
 0x161   : > { %v2262_v20 = vadd.f32 %v2223_v22, %v2056_v62  ;;  %v1686_v0 = vpop.f32.mrf.mxu2 }
 0x162   : > { %v1723_v37 = vadd.f32 %v1686_v0, %v1569_v15 }
 0x163   : > { %v2282_v56 = vadd.f32 %v3816_v3, %v2262_v20 }
 0x164   : > { %v2226_v6 = vpop.f32.mrf.mxu0 }
 0x165   : > { %v2298_v57 = vmax.f32 %v2282_v56, 0.0 }
 0x166   : > { %v2020_v18 = vpop.f32.mrf.mxu3  ;;  %v1537_v43 = vpop.f32.mrf.mxu1 }
 0x167   : > { %v2314_v1 = vadd.f32 %v2298_v57, %v2297_v13  ;;  %v2057_v49 = vadd.f32 %v2020_v18, %v1723_v37  ;;  %v1571_v36 = vadd.f32 %v1537_v43, %v3652_v4 }
 0x169   : > { %v2263_v7 = vadd.f32 %v2226_v6, %v2057_v49  ;;  %v1688_v17 = vpop.f32.mrf.mxu2 }
 0x16a   : > { %v1724_v60 = vadd.f32 %v1688_v17, %v1570_v11 }
 0x16b   : > { %v2283_v58 = vadd.f32 %v3816_v3, %v2263_v7 }
 0x16c   : > { %v2228_v26 = vpop.f32.mrf.mxu0 }
 0x16d   : > { %v2299_v50 = vmax.f32 %v2283_v58, 0.0 }
 0x16e   : > { %v2022_v48 = vpop.f32.mrf.mxu3  ;;  %v1539_v21 = vpop.f32.mrf.mxu1 }
 0x16f   : > { %v2315_v42 = vadd.f32 %v2314_v1, %v2299_v50  ;;  %v2058_v31 = vadd.f32 %v2022_v48, %v1724_v60  ;;  %v1572_v14 = vadd.f32 %v1539_v21, %v3666_v51 }
 0x171   : > { %v2264_v40 = vadd.f32 %v2228_v26, %v2058_v31  ;;  %v1691_v32 = vpop.f32.mrf.mxu2 }
 0x172   : > { %v1725_v2 = vadd.f32 %v1691_v32, %v1571_v36 }
 0x173   : > { %v2284_v47 = vadd.f32 %v3816_v3, %v2264_v40 }
 0x174   : > { %v2231_v52 = vpop.f32.mrf.mxu0 }
 0x175   : > { %v2300_v29 = vmax.f32 %v2284_v47, 0.0 }
 0x176   : > { %v2025_v38 = vpop.f32.mrf.mxu3  ;;  %v1542_v4 = vpop.f32.mrf.mxu1 }
 0x177   : > { %v2316_v34 = vadd.f32 %v2315_v42, %v2300_v29  ;;  %v2059_v8 = vadd.f32 %v2025_v38, %v1725_v2  ;;  %v1573_v61 = vadd.f32 %v1542_v4, %v3684_v28 }
 0x179   : > { %v2265_v59 = vadd.f32 %v2231_v52, %v2059_v8  ;;  %v1693_v63 = vpop.f32.mrf.mxu2 }
 0x17a   : > { %v1726_v53 = vadd.f32 %v1693_v63, %v1572_v14 }
 0x17b   : > { %v2285_v45 = vadd.f32 %v3816_v3, %v2265_v59 }
 0x17c   : > { %v2233_v39 = vpop.f32.mrf.mxu0 }
 0x17d   : > { %v2301_v10 = vmax.f32 %v2285_v45, 0.0 }
 0x17e   : > { %v2027_v33 = vpop.f32.mrf.mxu3  ;;  %v1544_v5 = vpop.f32.mrf.mxu1 }
 0x17f   : > { %v2317_v24 = vadd.f32 %v2316_v34, %v2301_v10  ;;  %v2060_v15 = vadd.f32 %v2027_v33, %v1726_v53  ;;  %v1574_v37 = vadd.f32 %v1544_v5, %v3706_v55 }
 0x181   : > { %v2266_v41 = vadd.f32 %v2233_v39, %v2060_v15  ;;  %v1696_v19 = vpop.f32.mrf.mxu2 }
 0x182   : > { %v1727_v23 = vadd.f32 %v1696_v19, %v1573_v61 }
 0x183   : > { %v2286_v22 = vadd.f32 %v3816_v3, %v2266_v41 }
 0x184   : > { %v2236_v54 = vpop.f32.mrf.mxu0 }
 0x185   : > { %v2302_v62 = vmax.f32 %v2286_v22, 0.0 }
 0x186   : > { %v2030_v51 = vpop.f32.mrf.mxu3  ;;  %v1547_v11 = vpop.f32.mrf.mxu1 }
 0x187   : > { %v2318_v46 = vadd.f32 %v2317_v24, %v2302_v62  ;;  %v2061_v20 = vadd.f32 %v2030_v51, %v1727_v23  ;;  %v1575_v7 = vadd.f32 %v1547_v11, %v3725_v16 }
 0x189   : > { %v2267_v0 = vadd.f32 %v2236_v54, %v2061_v20  ;;  %v1698_v56 = vpop.f32.mrf.mxu2 }
 0x18a   : > { %v1728_v13 = vadd.f32 %v1698_v56, %v1574_v37 }
 0x18b   : > { %v2287_v6 = vadd.f32 %v3816_v3, %v2267_v0 }
 0x18c   : > { %v2238_v57 = vpop.f32.mrf.mxu0 }
 0x18d   : > { %v2303_v18 = vmax.f32 %v2287_v6, 0.0 }
 0x18e   : > { %v2032_v28 = vpop.f32.mrf.mxu3  ;;  %v1549_v43 = vpop.f32.mrf.mxu1 }
 0x18f   : > { %v2319_v1 = vadd.f32 %v2318_v46, %v2303_v18  ;;  %v2062_v49 = vadd.f32 %v2032_v28, %v1728_v13  ;;  %v1576_v40 = vadd.f32 %v1549_v43, %v3746_v9 }
 0x191   : > { %v2268_v36 = vadd.f32 %v2238_v57, %v2062_v49  ;;  %v1701_v17 = vpop.f32.mrf.mxu2 }
 0x192   : > { %v1729_v58 = vadd.f32 %v1701_v17, %v1575_v7 }
 0x193   : > { %v2288_v60 = vadd.f32 %v3816_v3, %v2268_v36 }
 0x194   : > { %v2241_v26 = vpop.f32.mrf.mxu0 }
 0x195   : > { %v2304_v50 = vmax.f32 %v2288_v60, 0.0 }
 0x196   : > { %v2035_v55 = vpop.f32.mrf.mxu3  ;;  %v1552_v48 = vpop.f32.mrf.mxu1 }
 0x197   : > { %v2320_v21 = vadd.f32 %v2319_v1, %v2304_v50  ;;  %v2063_v42 = vadd.f32 %v2035_v55, %v1729_v58  ;;  %v1577_v59 = vadd.f32 %v1552_v48, %v3766_v30 }
 0x199   : > { %v2269_v31 = vadd.f32 %v2241_v26, %v2063_v42  ;;  %v1703_v32 = vpop.f32.mrf.mxu2 }
 0x19a   : > { %v1730_v47 = vadd.f32 %v1703_v32, %v1576_v40 }
 0x19b   : > { %v2289_v2 = vadd.f32 %v3816_v3, %v2269_v31 }
 0x19c   : > { %v2243_v52 = vpop.f32.mrf.mxu0 }
 0x19d   : > { %v2305_v29 = vmax.f32 %v2289_v2, 0.0 }
 0x19e   : > { %v2037_v16 = vpop.f32.mrf.mxu3  ;;  %v1554_v38 = vpop.f32.mrf.mxu1 }
 0x19f   : > { %v2321_v4 = vadd.f32 %v2320_v21, %v2305_v29  ;;  %v2064_v34 = vadd.f32 %v2037_v16, %v1730_v47  ;;  %v1578_v15 = vadd.f32 %v1554_v38, %v3780_v27 }
 0x1a1   : > { %v2270_v8 = vadd.f32 %v2243_v52, %v2064_v34  ;;  %v1706_v14 = vpop.f32.mrf.mxu2 }
 0x1a2   : > { %v1731_v45 = vadd.f32 %v1706_v14, %v1577_v59 }
 0x1a3   : > { %v2290_v63 = vadd.f32 %v3816_v3, %v2270_v8 }
 0x1a4   : > { %v2246_v53 = vpop.f32.mrf.mxu0 }
 0x1a5   : > { %v2306_v39 = vmax.f32 %v2290_v63, 0.0 }
 0x1a6   : > { %v2040_v9 = vpop.f32.mrf.mxu3  ;;  %v1557_v5 = vpop.f32.mrf.mxu1 }
 0x1a7   : > { %v2322_v10 = vadd.f32 %v2321_v4, %v2306_v39  ;;  %v2065_v33 = vadd.f32 %v2040_v9, %v1731_v45  ;;  %v1579_v11 = vadd.f32 %v1557_v5, %v3792_v25 }
 0x1a9   : > { %v2271_v24 = vadd.f32 %v2246_v53, %v2065_v33  ;;  %v1708_v41 = vpop.f32.mrf.mxu2 }
 0x1aa   : > { %v1732_v19 = vadd.f32 %v1708_v41, %v1578_v15 }
 0x1ab   : > { %v2291_v61 = vadd.f32 %v3816_v3, %v2271_v24 }
 0x1ac   : > { %v2248_v22 = vpop.f32.mrf.mxu0 }
 0x1ad   : > { %v2307_v23 = vmax.f32 %v2291_v61, 0.0 }
 0x1ae   : > { %v2042_v30 = vpop.f32.mrf.mxu3  ;;  %v1559_v20 = vpop.f32.mrf.mxu1 }
 0x1af   : > { %v2323_v54 = vadd.f32 %v2322_v10, %v2307_v23  ;;  %v2066_v62 = vadd.f32 %v2042_v30, %v1732_v19  ;;  %v1580_v28 = vadd.f32 %v1559_v20, %v3801_v35 }
 0x1b1   : > { %v2272_v51 = vadd.f32 %v2248_v22, %v2066_v62  ;;  %v1711_v46 = vpop.f32.mrf.mxu2 }
 0x1b2   : > { %v1733_v37 = vadd.f32 %v1711_v46, %v1579_v11 }
 0x1b3   : > { %v2292_v0 = vadd.f32 %v3816_v3, %v2272_v51 }
 0x1b4   : > { %v2251_v56 = vpop.f32.mrf.mxu0 }
 0x1b5   : > { %v2308_v6 = vmax.f32 %v2292_v0, 0.0 }
 0x1b6   : > { %v2045_v27 = vpop.f32.mrf.mxu3  ;;  %v1562_v36 = vpop.f32.mrf.mxu1 }
 0x1b7   : > { %v2324_v13 = vadd.f32 %v2323_v54, %v2308_v6  ;;  %v2067_v57 = vadd.f32 %v2045_v27, %v1733_v37  ;;  %v1581_v50 = vadd.f32 %v1562_v36, %v3807_v44 }
 0x1b9   : > { %v2273_v18 = vadd.f32 %v2251_v56, %v2067_v57  ;;  %v1713_v43 = vpop.f32.mrf.mxu2 }
 0x1ba   : > { %v1734_v49 = vadd.f32 %v1713_v43, %v1580_v28 }
 0x1bb   : > { %v2293_v1 = vadd.f32 %v3816_v3, %v2273_v18 }
 0x1bc   : > { %v2253_v7 = vpop.f32.mrf.mxu0 }
 0x1bd   : > { %v2309_v25 = vmax.f32 %v2293_v1, 0.0 }
 0x1be   : > { %v2047_v17 = vpop.f32.mrf.mxu3  ;;  %v1564_v31 = vpop.f32.mrf.mxu1 }
 0x1bf   : > { %v2325_v60 = vadd.f32 %v2324_v13, %v2309_v25  ;;  %v2068_v58 = vadd.f32 %v2047_v17, %v1734_v49  ;;  %v1582_v52 = vadd.f32 %v1564_v31, %v3810_v12  ;;  %v2313_v12 = vld [vmem:[#allocation2] sm:$0x1] }
 0x1c1   : > { %v2274_v26 = vadd.f32 %v2253_v7, %v2068_v58  ;;  %v1716_v55 = vpop.f32.mrf.mxu2 }
 0x1c2   : > { %v1735_v21 = vadd.f32 %v1716_v55, %v1581_v50 }
 0x1c3   : > { %v2294_v48 = vadd.f32 %v3816_v3, %v2274_v26 }
 0x1c4   : > { %v2256_v35 = vpop.f32.mrf.mxu0 }
 0x1c5   : > { %v2310_v42 = vmax.f32 %v2294_v48, 0.0 }
 0x1c6   : > { %v2050_v40 = vpop.f32.mrf.mxu3 }
 0x1c7   : > { %v2326_v32 = vadd.f32 %v2325_v60, %v2310_v42  ;;  %v2069_v2 = vadd.f32 %v2050_v40, %v1735_v21 }
 0x1c9   : > { %v2275_v47 = vadd.f32 %v2256_v35, %v2069_v2  ;;  %v1718_v29 = vpop.f32.mrf.mxu2 }
 0x1ca   : > { %v1736_v38 = vadd.f32 %v1718_v29, %v1582_v52 }
 0x1cb   : > { %v2295_v16 = vadd.f32 %v3816_v3, %v2275_v47 }
 0x1cc   : > { %v2258_v59 = vpop.f32.mrf.mxu0 }
 0x1cd   : > { %v2311_v4 = vmax.f32 %v2295_v16, 0.0 }
 0x1ce   : > { %v2052_v34 = vpop.f32.mrf.mxu3 }
 0x1cf   : > { %v2327_v44 = vadd.f32 %v2326_v32, %v2311_v4  ;;  %v2070_v8 = vadd.f32 %v2052_v34, %v1736_v38 }
 0x1d1   : > { %v2276_v14 = vadd.f32 %v2258_v59, %v2070_v8 }
 0x1d3   : > { %v2296_v63 = vadd.f32 %v3816_v3, %v2276_v14 }
 0x1d5   : > { %v2312_v45 = vmax.f32 %v2296_v63, 0.0 }
 0x1d7   : > { %v2328_v53 = vadd.f32 %v2327_v44, %v2312_v45 }
 0x1d9   : > { %v2329_v39 = vrot.slane %v2328_v53, 4 }
 0x1db   : > { %v2330_v9 = vadd.f32 %v2329_v39, %v2328_v53 }
 0x1dd   : > { %v2331_v10 = vrot.slane %v2330_v9, 2 }
 0x1df   : > { %v2332_v33 = vadd.f32 %v2331_v10, %v2330_v9 }
 0x1e1   : > { %v2333_v5 = vrot.slane %v2332_v33, 1 }
 0x1e3   : > { %v2334_v24 = vadd.f32 %v2333_v5, %v2332_v33  ;;  %2340 = sbr.rel (%p2847_p7) target bundleno = 918 (0x396), region = 48 }
 0x1e5   : > { %v2335_v15 = vadd.f32 %v2334_v24, %v2313_v12 }
 0x1e7   : > { %2336 = vst [vmem:[#allocation2] sm:$0x1] %v2335_v15 }
 0x1e8   : > { %v2914_v41 = vld [vmem:[%s3909_s3 + $0x38] sm:$0xff]  ;;  %v2913_v3 = vld [vmem:[%s3909_s3 + $0x30] sm:$0xff]  ;;  %v2912_v61 = vld [vmem:[%s3909_s3 + $0x28] sm:$0xff]  ;;  %v2422_v46 = vlaneseq }
 0x1e9   : > { %2409 = vmatpush.bf16.msra.mxu0 %v2914_v41  ;;  %v2911_v19 = vld [vmem:[%s3909_s3 + $0x20] sm:$0xff]  ;;  %v2910_v22 = vld [vmem:[%s3909_s3 + $0x18] sm:$0xff]  ;;  %v2909_v23 = vld [vmem:[%s3909_s3 + $0x10] sm:$0xff] }
 0x1ea   : > { %v2908_v30 = vld [vmem:[%s3909_s3 + $0x8] sm:$0xff]  ;;  %v2907_v51 = vld [vmem:[%s3909_s3] sm:$0xff]  ;;  %v2423_v20 = vand.u32 127, %v2422_v46 }
 0x1eb   : > { %v2360_v0 = vld [vmem:[%s3910_s4] sm:$0x1] }
 0x1ec   : > { %vm2425_vm9 = vcmp.lt.s32.totalorder %v2423_v20, 8  ;;  %vm2440_vm10 = vcmp.ge.s32.totalorder %v2423_v20, 8  ;;  %vm2441_vm11 = vcmp.lt.s32.totalorder %v2423_v20, 12 }
 0x1ed   : > { %2410 = vmatpush.bf16.msra.mxu0 %v2913_v3  ;;  %vm3877_vm12 = vmand %vm2440_vm10, %vm2441_vm11 }
 0x1ee   : > { %v2341_v54 = vld [vmem:[#allocation2] sm:$0x1] }
 0x1ef   : > { %v2342_v62 = vmul.f32 0.00390625, %v2341_v54 }
 0x1f1   : > { %2411 = vmatpush.bf16.msra.mxu0 %v2912_v61  ;;  %v2343_v11 = vpack.c.bf16 %v2342_v62, %v2342_v62 }
 0x1f5   : > { %2412 = vmatpush.bf16.msra.mxu0 %v2911_v19 }
 0x1f9   : > { %2413 = vmatpush.bf16.msra.mxu0 %v2910_v22 }
 0x1fd   : > { %2414 = vmatpush.bf16.msra.mxu0 %v2909_v23 }
 0x201   : > { %2415 = vmatpush.bf16.msra.mxu0 %v2908_v30 }
 0x205   : > { %2416 = vmatpush.bf16.msra.mxu0 %v2907_v51 }
 0x208   : > { %2417 = vmatmul.bf16.vlgmr.msra.gmra.mxu0 %v2343_v11 }
 0x285   : > { %v2418_v37 = vpop.f32.mrf.mxu0 }
 0x286   : > { %v2419_v56 = vadd.f32 %v2418_v37, %v2360_v0 }
 0x288   : > { %v2427_v6 = vsel %vm2425_vm9, %v2419_v56, -1e+30  ;;  %v2443_v18 = vsel %vm3877_vm12, %v2419_v56, -1e+30 }
 0x289   : > { %v2428_v27 = vsel %vm516_vm0, %v2427_v6, -inf  ;;  %v2444_v28 = vsel %vm516_vm0, %v2443_v18, -inf }
 0x28a   : > { %2429 = vmax.xlane.f32.xlu0 %v2428_v27 }
 0x28d   : > { %v2420_v57 = vpop.f32.mrf.mxu0 }
 0x292   : > { %2445 = vmax.xlane.f32.xlu0 %v2444_v28 }
 0x2fd   : > { %v2430_v43 = vpop.xlane.xlu0 %2429 }
 0x2fe   : > { %v2431_v1 = vsub.f32 %v2419_v56, %v2430_v43 }
 0x300   : > { %v2432_v49 = vmul.f32 1.442695, %v2431_v1 }
 0x302   : > { %2962 = vpow2.f32 %v2432_v49 }
 0x305   : > { %v2446_v36 = vpop.xlane.xlu0 %2445 }
 0x306   : > { %v2447_v7 = vsub.f32 %v2419_v56, %v2446_v36 }
 0x308   : > { %v2963_v25 = vpop.eup %2962  ;;  %v2448_v17 = vmul.f32 1.442695, %v2447_v7 }
 0x309   : > { %v2434_v60 = vsel %vm2425_vm9, %v2963_v25, 0.0 }
 0x30a   : > { %2964 = vpow2.f32 %v2448_v17  ;;  %v2435_v58 = vsel %vm516_vm0, %v2434_v60, 0.0 }
 0x30b   : > { %2436 = vadd.xlane.f32.xlu1 %v2435_v58 }
 0x310   : > { %v2965_v26 = vpop.eup %2964 }
 0x311   : > { %v2450_v50 = vsel %vm3877_vm12, %v2965_v26, 0.0 }
 0x312   : > { %v2451_v55 = vsel %vm516_vm0, %v2450_v50, 0.0 }
 0x313   : > { %2452 = vadd.xlane.f32.xlu1 %v2451_v55 }
 0x37e   : > { %v2437_v48 = vpop.xlane.xlu1 %2436 }
 0x37f   : > { %2966 = vrcp.f32 %v2437_v48 }
 0x385   : > { %v2967_v42 = vpop.eup %2966 }
 0x386   : > { %v2453_v21 = vpop.xlane.xlu1 %2452  ;;  %v2439_v35 = vmul.f32 %v2967_v42, %v2434_v60 }
 0x387   : > { %2968 = vrcp.f32 %v2453_v21 }
 0x38d   : > { %v2969_v31 = vpop.eup %2968 }
 0x38e   : > { %v2455_v40 = vmul.f32 %v2969_v31, %v2450_v50 }
 0x390   : > { %v2456_v32 = vadd.f32 %v2455_v40, %v2439_v35 }
 0x392   : > { %v2458_v2 = vrot.slane %v2456_v32, 7 }
 0x394   : > { %v2460_v47 = vsel %vm516_vm0, %v2419_v56, %v2458_v2 }
 0x395   : > { %2461 = vst [vmem:[%s3077_s29] sm:$0x3] %v2460_v47 }
 0x396 PF: > { %s15_s22 = sadd.s32 1, %s3008_s22   ;;  %s3918_s18 = smov %s3000_s20 }
 0x397   : > { %p12_p8 = scmp.ge.s32.totalorder %s15_s22, 6   ;;  %s3919_s19 = smov %s3004_s21 }
 0x398   : > { %s3920_s20 = smov %s3923_s23  ;;  %s3921_s21 = smov %s3927_s24 }
 0x399   :  { %14 = sbr.rel (!%p12_p8) target bundleno = 3 (0x3), region = 89 }

</bundles_post_ra>
